<compile_context>
chip_gen: v7x
topology: tpu7x:2x2x1
jax: 0.10.0
libtpu: 0.0.40
codegen_flags: <defaults>
</compile_context>

<pallas_src>
import functools

import jax
import jax.numpy as jnp
from jax import lax
from jax.experimental import pallas as pl
from jax.experimental.pallas import tpu as pltpu


def _otmatch_kernel(qf_ref, tf_ref, qa_col_ref, qa_row_ref, ta_row_ref,
                    label_ref, out_ref, u_ref, v_ref, flag_ref, *,
                    metric, margin, iterations, tol, check_every,
                    use_mxu_sums):
    qf = qf_ref[...]            # (D, Nq)  f32, native "columns are samples"
    tf_ = tf_ref[...]           # (D, Nt)  f32
    qa_col = qa_col_ref[...]    # (Nq, 1)  f32  (OT row marginal mu)
    qa_row = qa_row_ref[...]    # (1, Nq)  f32  (same values, row layout)
    ta_row = ta_row_ref[...]    # (1, Nt)  f32  (OT col marginal nu)

    d_dim, nq = qf.shape
    nt = tf_.shape[1]
    f32 = jnp.float32

    # Constant "ones" vectors used to run reductions on the MXU.
    ones_d1 = jnp.ones((d_dim, 1), f32)
    ones_nq1 = jnp.ones((nq, 1), f32)
    ones_nt1 = jnp.ones((nt, 1), f32)

    # ---- cost matrix M (Nq, Nt), computed directly from the (D, N) layout ----
    qt = lax.dot_general(qf, tf_, (((0,), (0,)), ((), ())),
                         preferred_element_type=f32)           # qf.T @ tf
    if metric == 'product':
        M = qt
    else:  # 'euclidean'
        # TODO(synk): `pairwise_distances` is not defined in the source module;
        # using squared-euclidean distances clamped at 0 (matches the common
        # PyTorch helper of that name and the in-file JAX reference).
        qn_col = lax.dot_general(qf * qf, ones_d1, (((0,), (0,)), ((), ())),
                                 preferred_element_type=f32)   # (Nq, 1)
        tn_row = jnp.sum(tf_ * tf_, axis=0, keepdims=True)     # (1, Nt)
        M = jnp.maximum(qn_col + tn_row - 2.0 * qt, 0.0)

    # ---- log-space Sinkhorn (log_optimal_transport / log_sinkhorn_iterations)
    # TODO(synk): the module's `eps` is unused in the forward pass; zero
    # attention weights would give -inf exactly as in the PyTorch original.
    log_mu = jnp.log(qa_col)    # (Nq, 1)
    log_nu = jnp.log(ta_row)    # (1, Nt)

    def lse_rows(x):            # logsumexp over Nt (lanes) -> (Nq, 1)
        m = jnp.max(x, axis=1, keepdims=True)
        e = jnp.exp(x - m)
        if use_mxu_sums:        # sum on the otherwise-idle MXU
            s = lax.dot_general(e, ones_nt1, (((1,), (0,)), ((), ())),
                                preferred_element_type=f32)
        else:
            s = jnp.sum(e, axis=1, keepdims=True)
        return m + jnp.log(s)

    def lse_cols(x):            # logsumexp over Nq (sublanes) -> (1, Nt)
        m = jnp.max(x, axis=0, keepdims=True)
        e = jnp.exp(x - m)
        if use_mxu_sums:
            s = lax.dot_general(ones_nq1, e, (((0,), (0,)), ((), ())),
                                preferred_element_type=f32)
        else:
            s = jnp.sum(e, axis=0, keepdims=True)
        return m + jnp.log(s)

    def sinkhorn_step(u, v):
        u = log_mu - lse_rows(M + v)
        v = log_nu - lse_cols(M + u)
        return u, v

    u_ref[...] = jnp.zeros_like(log_mu)
    v_ref[...] = jnp.zeros_like(log_nu)

    n_blocks = iterations // check_every
    tail = iterations - n_blocks * check_every

    def block_cond(carry):
        i, not_converged = carry
        return jnp.logical_and(i < n_blocks, not_converged > 0)

    def block_body(carry):
        i, _ = carry
        u = u_ref[...]
        v = v_ref[...]
        u_start = u
        for _ in range(check_every):            # unrolled Sinkhorn block
            u, v = sinkhorn_step(u, v)
        u_ref[...] = u
        v_ref[...] = v
        # Convergence check: max |u - u_prev_block| > tol ?  The scalar used
        # by the while condition is read back through a (1,1) VMEM scratch so
        # the loop carry stays scalar-only.
        delta = jnp.max(jnp.abs(u - u_start), axis=0, keepdims=True)  # (1, 1)
        flag_ref[...] = (delta > tol).astype(jnp.int32)
        return i + 1, flag_ref[0, 0]

    if n_blocks > 0:
        lax.while_loop(block_cond, block_body, (jnp.int32(0), jnp.int32(1)))

    u = u_ref[...]
    v = v_ref[...]
    for _ in range(tail):                        # remainder (< check_every)
        u, v = sinkhorn_step(u, v)

    P = jnp.exp(M + u + v)      # (Nq, Nt) transport plan

    # ---- distance and contrastive loss (still in the (D, N) orientation) ----
    pt_t = lax.dot_general(tf_, P, (((1,), (1,)), ((), ())),
                           preferred_element_type=f32)         # (D, Nq) = (P @ tf.T).T
    resid = qa_row * qf - pt_t                                  # (D, Nq)
    dist = jnp.sqrt(jnp.sum(resid * resid, axis=0, keepdims=True))  # (1, Nq)
    d = jnp.sum(dist, axis=1, keepdims=True)                    # (1, 1)

    label = label_ref[0]
    loss = (0.5 * label * d * d
            + 0.5 * (1.0 - label) * jnp.square(jnp.maximum(margin - d, 0.0)))
    out_ref[...] = loss


def otmatch_contrastive_loss(query, target, label, *, metric='euclidean',
                             margin=0.7, eps=1e-6, iterations=250,
                             convergence_tol=1e-6, check_every=10):
    """query/target: (features (D, N), attention (N,)) tuples. Returns scalar loss.

    convergence_tol: early-exit threshold on max|u - u_prev| over a check
    block (None => always run exactly `iterations` Sinkhorn iterations).
    """
    del eps  # unused in the reference forward path as well
    qf, qa = query
    tf_, ta = target
    qf = jnp.asarray(qf, jnp.float32)                    # (D, Nq) -- no transpose
    tf_ = jnp.asarray(tf_, jnp.float32)                  # (D, Nt)
    qa = jnp.asarray(qa, jnp.float32)
    ta = jnp.asarray(ta, jnp.float32)
    d_dim, nq = qf.shape
    nt = tf_.shape[1]

    qa_col = qa.reshape(nq, 1)
    qa_row = qa.reshape(1, nq)
    ta_row = ta.reshape(1, nt)
    lab = jnp.asarray(label, jnp.float32).reshape(1)

    iterations = int(iterations)
    check_every = max(1, min(int(check_every), iterations)) if iterations else 1
    tol = -1.0 if convergence_tol is None else float(convergence_tol)
    # MXU-offloaded logsumexp sums only pay off once the XLU reductions are the
    # saturating slot; tiny problems are latency-bound.
    use_mxu_sums = (nq * nt) >= (128 * 128)

    # Everything is resident in VMEM; size the scoped limit with headroom but
    # stay inside v7x's 64 MiB physical VMEM.
    # TODO(synk): problems whose cost matrix + temps exceed ~48 MiB need a
    # chunked/online logsumexp instead of a fully resident M.
    est_bytes = 4 * (6 * nq * nt + 4 * d_dim * (nq + nt)) + (2 << 20)
    vmem_limit = int(min(max(est_bytes, 32 << 20), 64 << 20))

    kernel = functools.partial(
        _otmatch_kernel, metric=metric, margin=float(margin),
        iterations=iterations, tol=tol, check_every=check_every,
        use_mxu_sums=use_mxu_sums)

    # TODO(synk): if many (query, target) pairs are evaluated per step, add a
    # leading batch grid axis with dimension_semantics=("parallel",) so v7x's
    # second TensorCore is used instead of calling the kernel per pair.
    out = pl.pallas_call(
        kernel,
        out_shape=jax.ShapeDtypeStruct((1, 1), jnp.float32),
        in_specs=[
            pl.BlockSpec(memory_space=pltpu.MemorySpace.VMEM),  # qf (D, Nq)
            pl.BlockSpec(memory_space=pltpu.MemorySpace.VMEM),  # tf (D, Nt)
            pl.BlockSpec(memory_space=pltpu.MemorySpace.VMEM),  # qa (Nq, 1)
            pl.BlockSpec(memory_space=pltpu.MemorySpace.VMEM),  # qa (1, Nq)
            pl.BlockSpec(memory_space=pltpu.MemorySpace.VMEM),  # ta (1, Nt)
            pl.BlockSpec(memory_space=pltpu.MemorySpace.SMEM),  # label (1,)
        ],
        out_specs=pl.BlockSpec(memory_space=pltpu.MemorySpace.VMEM),
        scratch_shapes=[
            pltpu.VMEM((nq, 1), jnp.float32),   # u
            pltpu.VMEM((1, nt), jnp.float32),   # v
            pltpu.VMEM((1, 1), jnp.int32),      # convergence flag
        ],
        compiler_params=pltpu.CompilerParams(vmem_limit_bytes=vmem_limit),
    )(qf, tf_, qa_col, qa_row, ta_row, lab)
    return out[0, 0]


# ---------------- pure-JAX reference (for correctness check) ----------------
def _otmatch_ref(query, target, label, metric, margin, iterations):
    qf = jnp.asarray(query[0], jnp.float32).T
    tf_ = jnp.asarray(target[0], jnp.float32).T
    qa = jnp.asarray(query[1], jnp.float32)
    ta = jnp.asarray(target[1], jnp.float32)
    if metric == 'product':
        M = qf @ tf_.T
    else:
        qn = jnp.sum(qf ** 2, 1, keepdims=True)
        tn = jnp.sum(tf_ ** 2, 1, keepdims=True).T
        M = jnp.maximum(qn + tn - 2.0 * (qf @ tf_.T), 0.0)
    log_mu = jnp.log(qa)
    log_nu = jnp.log(ta)

    def body(_, carry):
        u, v = carry
        u = log_mu - jax.scipy.special.logsumexp(M + v[None, :], axis=1)
        v = log_nu - jax.scipy.special.logsumexp(M + u[:, None], axis=0)
        return (u, v)

    u, v = lax.fori_loop(0, iterations, body,
                         (jnp.zeros_like(log_mu), jnp.zeros_like(log_nu)))
    P = jnp.exp(M + u[:, None] + v[None, :])
    resid = qa[:, None] * qf - P @ tf_
    d = jnp.sum(jnp.sqrt(jnp.sum(resid ** 2, axis=1)))
    return (0.5 * label * d ** 2
            + 0.5 * (1.0 - label) * jnp.maximum(margin - d, 0.0) ** 2)


if __name__ == "__main__":
    def run_case(seed, D, Nq, Nt, metric, iterations=250, margin=0.7, label=1.0):
        k1, k2, k3, k4 = jax.random.split(jax.random.PRNGKey(seed), 4)
        # raw module layout: features are (D, N), attention is (N,) and positive
        qf = jax.random.normal(k1, (D, Nq), jnp.float32)
        tf_ = jax.random.normal(k2, (D, Nt), jnp.float32)
        qa = jax.nn.softmax(jax.random.normal(k3, (Nq,), jnp.float32))
        ta = jax.nn.softmax(jax.random.normal(k4, (Nt,), jnp.float32))
        loss = otmatch_contrastive_loss((qf, qa), (tf_, ta), label,
                                        metric=metric, margin=margin,
                                        iterations=iterations)
        loss = jax.block_until_ready(loss)
        ref = _otmatch_ref((qf, qa), (tf_, ta), label, metric, margin, iterations)
        good = bool(jnp.allclose(loss, ref, rtol=1e-3, atol=1e-3))
        if not good:
            print(f"mismatch D={D} Nq={Nq} Nt={Nt} metric={metric}: "
                  f"pallas={loss}, ref={ref}")
        return good

    ok = True
    # Small shapes (XLU-sum path, both metrics).
    ok &= run_case(0, D=32, Nq=8, Nt=16, metric='euclidean')
    ok &= run_case(0, D=32, Nq=8, Nt=16, metric='product')
    # Larger shape: exercises the MXU-sum logsumexp path and the block-wise
    # early-exit machinery of the Sinkhorn while_loop.
    ok &= run_case(1, D=64, Nq=128, Nt=128, metric='euclidean')

    if ok:
        print("KERNEL_OK")
</pallas_src>

<mosaic_0001>
module attributes {stable_mosaic.version = 11 : i64} {
  func.func @_otmatch_kernel(%arg0: memref<32x8xf32, #tpu.memory_space<vmem>>, %arg1: memref<32x16xf32, #tpu.memory_space<vmem>>, %arg2: memref<8x1xf32, #tpu.memory_space<vmem>>, %arg3: memref<1x8xf32, #tpu.memory_space<vmem>>, %arg4: memref<1x16xf32, #tpu.memory_space<vmem>>, %arg5: memref<1xf32, #tpu.memory_space<smem>>, %arg6: memref<1x1xf32, #tpu.memory_space<vmem>>, %arg7: memref<8x1xf32, #tpu.memory_space<vmem>>, %arg8: memref<1x16xf32, #tpu.memory_space<vmem>>, %arg9: memref<1x1xi32, #tpu.memory_space<vmem>>) attributes {dimension_semantics = [], scalar_prefetch = 0 : i64, scratch_operands = 3 : i64, tpu.core_type = #tpu.core_type<tc>} {
    %c0 = arith.constant 0 : index
    %c0_0 = arith.constant 0 : index
    %0 = vector.load %arg0[%c0, %c0_0] : memref<32x8xf32, #tpu.memory_space<vmem>>, vector<32x8xf32>
    %c0_1 = arith.constant 0 : index
    %c0_2 = arith.constant 0 : index
    %1 = vector.load %arg1[%c0_1, %c0_2] : memref<32x16xf32, #tpu.memory_space<vmem>>, vector<32x16xf32>
    %c0_3 = arith.constant 0 : index
    %c0_4 = arith.constant 0 : index
    %2 = vector.load %arg2[%c0_3, %c0_4] : memref<8x1xf32, #tpu.memory_space<vmem>>, vector<8x1xf32>
    %c0_5 = arith.constant 0 : index
    %c0_6 = arith.constant 0 : index
    %3 = vector.load %arg3[%c0_5, %c0_6] : memref<1x8xf32, #tpu.memory_space<vmem>>, vector<1x8xf32>
    %c0_7 = arith.constant 0 : index
    %c0_8 = arith.constant 0 : index
    %4 = vector.load %arg4[%c0_7, %c0_8] : memref<1x16xf32, #tpu.memory_space<vmem>>, vector<1x16xf32>
    %cst = arith.constant 1.000000e+00 : f32
    %5 = vector.broadcast %cst : f32 to vector<32x1xf32>
    %cst_9 = arith.constant dense<0.000000e+00> : vector<8x16xf32>
    %6 = tpu.matmul %0, %1, %cst_9 {dimension_numbers = #tpu.dot_dimension_numbers<[0], [0], [1], [1], [0, 1, 1, 1], [], []>} : vector<32x8xf32>, vector<32x16xf32>, vector<8x16xf32> -> vector<8x16xf32>
    %7 = arith.mulf %0, %0 : vector<32x8xf32>
    %cst_10 = arith.constant dense<0.000000e+00> : vector<8x1xf32>
    %8 = tpu.matmul %7, %5, %cst_10 {dimension_numbers = #tpu.dot_dimension_numbers<[0], [0], [1], [1], [0, 1, 1, 1], [], []>} : vector<32x8xf32>, vector<32x1xf32>, vector<8x1xf32> -> vector<8x1xf32>
    %9 = arith.mulf %1, %1 : vector<32x16xf32>
    %cst_11 = arith.constant dense<0.000000e+00> : vector<16xf32>
    %10 = vector.multi_reduction <add>, %9, %cst_11 [0] : vector<32x16xf32> to vector<16xf32>
    %11 = vector.shape_cast %10 : vector<16xf32> to vector<1x16xf32>
    %12 = vector.broadcast %8 : vector<8x1xf32> to vector<8x16xf32>
    %13 = vector.broadcast %11 : vector<1x16xf32> to vector<8x16xf32>
    %14 = arith.addf %12, %13 : vector<8x16xf32>
    %cst_12 = arith.constant 2.000000e+00 : f32
    %15 = vector.broadcast %cst_12 : f32 to vector<8x16xf32>
    %16 = arith.mulf %15, %6 : vector<8x16xf32>
    %17 = arith.subf %14, %16 : vector<8x16xf32>
    %cst_13 = arith.constant 0.000000e+00 : f32
    %18 = vector.broadcast %cst_13 : f32 to vector<8x16xf32>
    %19 = arith.maximumf %17, %18 : vector<8x16xf32>
    %20 = math.log %2 : vector<8x1xf32>
    %21 = math.log %4 : vector<1x16xf32>
    %cst_14 = arith.constant 0.000000e+00 : f32
    %22 = vector.broadcast %cst_14 : f32 to vector<8x1xf32>
    %c0_15 = arith.constant 0 : index
    %c0_16 = arith.constant 0 : index
    %23 = vector.load %arg7[%c0_15, %c0_16] : memref<8x1xf32, #tpu.memory_space<vmem>>, vector<8x1xf32>
    tpu.vector_store %arg7[%c0_15, %c0_16], %22 {strides = array<i32>} : memref<8x1xf32, #tpu.memory_space<vmem>>, vector<8x1xf32>,
    %cst_17 = arith.constant 0.000000e+00 : f32
    %24 = vector.broadcast %cst_17 : f32 to vector<1x16xf32>
    %c0_18 = arith.constant 0 : index
    %c0_19 = arith.constant 0 : index
    %25 = vector.load %arg8[%c0_18, %c0_19] : memref<1x16xf32, #tpu.memory_space<vmem>>, vector<1x16xf32>
    tpu.vector_store %arg8[%c0_18, %c0_19], %24 {strides = array<i32>} : memref<1x16xf32, #tpu.memory_space<vmem>>, vector<1x16xf32>,
    %c0_i32 = arith.constant 0 : i32
    %c1_i32 = arith.constant 1 : i32
    %26:2 = scf.while (%arg10 = %c0_i32, %arg11 = %c1_i32) : (i32, i32) -> (i32, i32) {
      %c25_i32 = arith.constant 25 : i32
      %60 = arith.cmpi slt, %arg10, %c25_i32 : i32
      %c0_i32_35 = arith.constant 0 : i32
      %61 = arith.cmpi sgt, %arg11, %c0_i32_35 : i32
      %62 = arith.andi %60, %61 : i1
      scf.condition(%62) %arg10, %arg11 : i32, i32
    } do {
    ^bb0(%arg10: i32, %arg11: i32):
      %c0_35 = arith.constant 0 : index
      %c0_36 = arith.constant 0 : index
      %60 = vector.load %arg7[%c0_35, %c0_36] : memref<8x1xf32, #tpu.memory_space<vmem>>, vector<8x1xf32>
      %c0_37 = arith.constant 0 : index
      %c0_38 = arith.constant 0 : index
      %61 = vector.load %arg8[%c0_37, %c0_38] : memref<1x16xf32, #tpu.memory_space<vmem>>, vector<1x16xf32>
      %62 = vector.broadcast %61 : vector<1x16xf32> to vector<8x16xf32>
      %63 = arith.addf %19, %62 : vector<8x16xf32>
      %cst_39 = arith.constant dense<0xFF800000> : vector<8xf32>
      %64 = vector.multi_reduction <maximumf>, %63, %cst_39 [1] : vector<8x16xf32> to vector<8xf32>
      %65 = vector.shape_cast %64 : vector<8xf32> to vector<8x1xf32>
      %66 = vector.broadcast %65 : vector<8x1xf32> to vector<8x16xf32>
      %67 = arith.subf %63, %66 : vector<8x16xf32>
      %68 = math.exp %67 : vector<8x16xf32>
      %cst_40 = arith.constant dense<0.000000e+00> : vector<8xf32>
      %69 = vector.multi_reduction <add>, %68, %cst_40 [1] : vector<8x16xf32> to vector<8xf32>
      %70 = vector.shape_cast %69 : vector<8xf32> to vector<8x1xf32>
      %71 = math.log %70 : vector<8x1xf32>
      %72 = arith.addf %65, %71 : vector<8x1xf32>
      %73 = arith.subf %20, %72 : vector<8x1xf32>
      %74 = vector.broadcast %73 : vector<8x1xf32> to vector<8x16xf32>
      %75 = arith.addf %19, %74 : vector<8x16xf32>
      %cst_41 = arith.constant dense<0xFF800000> : vector<16xf32>
      %76 = vector.multi_reduction <maximumf>, %75, %cst_41 [0] : vector<8x16xf32> to vector<16xf32>
      %77 = vector.shape_cast %76 : vector<16xf32> to vector<1x16xf32>
      %78 = vector.broadcast %77 : vector<1x16xf32> to vector<8x16xf32>
      %79 = arith.subf %75, %78 : vector<8x16xf32>
      %80 = math.exp %79 : vector<8x16xf32>
      %cst_42 = arith.constant dense<0.000000e+00> : vector<16xf32>
      %81 = vector.multi_reduction <add>, %80, %cst_42 [0] : vector<8x16xf32> to vector<16xf32>
      %82 = vector.shape_cast %81 : vector<16xf32> to vector<1x16xf32>
      %83 = math.log %82 : vector<1x16xf32>
      %84 = arith.addf %77, %83 : vector<1x16xf32>
      %85 = arith.subf %21, %84 : vector<1x16xf32>
      %86 = vector.broadcast %85 : vector<1x16xf32> to vector<8x16xf32>
      %87 = arith.addf %19, %86 : vector<8x16xf32>
      %cst_43 = arith.constant dense<0xFF800000> : vector<8xf32>
      %88 = vector.multi_reduction <maximumf>, %87, %cst_43 [1] : vector<8x16xf32> to vector<8xf32>
      %89 = vector.shape_cast %88 : vector<8xf32> to vector<8x1xf32>
      %90 = vector.broadcast %89 : vector<8x1xf32> to vector<8x16xf32>
      %91 = arith.subf %87, %90 : vector<8x16xf32>
      %92 = math.exp %91 : vector<8x16xf32>
      %cst_44 = arith.constant dense<0.000000e+00> : vector<8xf32>
      %93 = vector.multi_reduction <add>, %92, %cst_44 [1] : vector<8x16xf32> to vector<8xf32>
      %94 = vector.shape_cast %93 : vector<8xf32> to vector<8x1xf32>
      %95 = math.log %94 : vector<8x1xf32>
      %96 = arith.addf %89, %95 : vector<8x1xf32>
      %97 = arith.subf %20, %96 : vector<8x1xf32>
      %98 = vector.broadcast %97 : vector<8x1xf32> to vector<8x16xf32>
      %99 = arith.addf %19, %98 : vector<8x16xf32>
      %cst_45 = arith.constant dense<0xFF800000> : vector<16xf32>
      %100 = vector.multi_reduction <maximumf>, %99, %cst_45 [0] : vector<8x16xf32> to vector<16xf32>
      %101 = vector.shape_cast %100 : vector<16xf32> to vector<1x16xf32>
      %102 = vector.broadcast %101 : vector<1x16xf32> to vector<8x16xf32>
      %103 = arith.subf %99, %102 : vector<8x16xf32>
      %104 = math.exp %103 : vector<8x16xf32>
      %cst_46 = arith.constant dense<0.000000e+00> : vector<16xf32>
      %105 = vector.multi_reduction <add>, %104, %cst_46 [0] : vector<8x16xf32> to vector<16xf32>
      %106 = vector.shape_cast %105 : vector<16xf32> to vector<1x16xf32>
      %107 = math.log %106 : vector<1x16xf32>
      %108 = arith.addf %101, %107 : vector<1x16xf32>
      %109 = arith.subf %21, %108 : vector<1x16xf32>
      %110 = vector.broadcast %109 : vector<1x16xf32> to vector<8x16xf32>
      %111 = arith.addf %19, %110 : vector<8x16xf32>
      %cst_47 = arith.constant dense<0xFF800000> : vector<8xf32>
      %112 = vector.multi_reduction <maximumf>, %111, %cst_47 [1] : vector<8x16xf32> to vector<8xf32>
      %113 = vector.shape_cast %112 : vector<8xf32> to vector<8x1xf32>
      %114 = vector.broadcast %113 : vector<8x1xf32> to vector<8x16xf32>
      %115 = arith.subf %111, %114 : vector<8x16xf32>
      %116 = math.exp %115 : vector<8x16xf32>
      %cst_48 = arith.constant dense<0.000000e+00> : vector<8xf32>
      %117 = vector.multi_reduction <add>, %116, %cst_48 [1] : vector<8x16xf32> to vector<8xf32>
      %118 = vector.shape_cast %117 : vector<8xf32> to vector<8x1xf32>
      %119 = math.log %118 : vector<8x1xf32>
      %120 = arith.addf %113, %119 : vector<8x1xf32>
      %121 = arith.subf %20, %120 : vector<8x1xf32>
      %122 = vector.broadcast %121 : vector<8x1xf32> to vector<8x16xf32>
      %123 = arith.addf %19, %122 : vector<8x16xf32>
      %cst_49 = arith.constant dense<0xFF800000> : vector<16xf32>
      %124 = vector.multi_reduction <maximumf>, %123, %cst_49 [0] : vector<8x16xf32> to vector<16xf32>
      %125 = vector.shape_cast %124 : vector<16xf32> to vector<1x16xf32>
      %126 = vector.broadcast %125 : vector<1x16xf32> to vector<8x16xf32>
      %127 = arith.subf %123, %126 : vector<8x16xf32>
      %128 = math.exp %127 : vector<8x16xf32>
      %cst_50 = arith.constant dense<0.000000e+00> : vector<16xf32>
      %129 = vector.multi_reduction <add>, %128, %cst_50 [0] : vector<8x16xf32> to vector<16xf32>
      %130 = vector.shape_cast %129 : vector<16xf32> to vector<1x16xf32>
      %131 = math.log %130 : vector<1x16xf32>
      %132 = arith.addf %125, %131 : vector<1x16xf32>
      %133 = arith.subf %21, %132 : vector<1x16xf32>
      %134 = vector.broadcast %133 : vector<1x16xf32> to vector<8x16xf32>
      %135 = arith.addf %19, %134 : vector<8x16xf32>
      %cst_51 = arith.constant dense<0xFF800000> : vector<8xf32>
      %136 = vector.multi_reduction <maximumf>, %135, %cst_51 [1] : vector<8x16xf32> to vector<8xf32>
      %137 = vector.shape_cast %136 : vector<8xf32> to vector<8x1xf32>
      %138 = vector.broadcast %137 : vector<8x1xf32> to vector<8x16xf32>
      %139 = arith.subf %135, %138 : vector<8x16xf32>
      %140 = math.exp %139 : vector<8x16xf32>
      %cst_52 = arith.constant dense<0.000000e+00> : vector<8xf32>
      %141 = vector.multi_reduction <add>, %140, %cst_52 [1] : vector<8x16xf32> to vector<8xf32>
      %142 = vector.shape_cast %141 : vector<8xf32> to vector<8x1xf32>
      %143 = math.log %142 : vector<8x1xf32>
      %144 = arith.addf %137, %143 : vector<8x1xf32>
      %145 = arith.subf %20, %144 : vector<8x1xf32>
      %146 = vector.broadcast %145 : vector<8x1xf32> to vector<8x16xf32>
      %147 = arith.addf %19, %146 : vector<8x16xf32>
      %cst_53 = arith.constant dense<0xFF800000> : vector<16xf32>
      %148 = vector.multi_reduction <maximumf>, %147, %cst_53 [0] : vector<8x16xf32> to vector<16xf32>
      %149 = vector.shape_cast %148 : vector<16xf32> to vector<1x16xf32>
      %150 = vector.broadcast %149 : vector<1x16xf32> to vector<8x16xf32>
      %151 = arith.subf %147, %150 : vector<8x16xf32>
      %152 = math.exp %151 : vector<8x16xf32>
      %cst_54 = arith.constant dense<0.000000e+00> : vector<16xf32>
      %153 = vector.multi_reduction <add>, %152, %cst_54 [0] : vector<8x16xf32> to vector<16xf32>
      %154 = vector.shape_cast %153 : vector<16xf32> to vector<1x16xf32>
      %155 = math.log %154 : vector<1x16xf32>
      %156 = arith.addf %149, %155 : vector<1x16xf32>
      %157 = arith.subf %21, %156 : vector<1x16xf32>
      %158 = vector.broadcast %157 : vector<1x16xf32> to vector<8x16xf32>
      %159 = arith.addf %19, %158 : vector<8x16xf32>
      %cst_55 = arith.constant dense<0xFF800000> : vector<8xf32>
      %160 = vector.multi_reduction <maximumf>, %159, %cst_55 [1] : vector<8x16xf32> to vector<8xf32>
      %161 = vector.shape_cast %160 : vector<8xf32> to vector<8x1xf32>
      %162 = vector.broadcast %161 : vector<8x1xf32> to vector<8x16xf32>
      %163 = arith.subf %159, %162 : vector<8x16xf32>
      %164 = math.exp %163 : vector<8x16xf32>
      %cst_56 = arith.constant dense<0.000000e+00> : vector<8xf32>
      %165 = vector.multi_reduction <add>, %164, %cst_56 [1] : vector<8x16xf32> to vector<8xf32>
      %166 = vector.shape_cast %165 : vector<8xf32> to vector<8x1xf32>
      %167 = math.log %166 : vector<8x1xf32>
      %168 = arith.addf %161, %167 : vector<8x1xf32>
      %169 = arith.subf %20, %168 : vector<8x1xf32>
      %170 = vector.broadcast %169 : vector<8x1xf32> to vector<8x16xf32>
      %171 = arith.addf %19, %170 : vector<8x16xf32>
      %cst_57 = arith.constant dense<0xFF800000> : vector<16xf32>
      %172 = vector.multi_reduction <maximumf>, %171, %cst_57 [0] : vector<8x16xf32> to vector<16xf32>
      %173 = vector.shape_cast %172 : vector<16xf32> to vector<1x16xf32>
      %174 = vector.broadcast %173 : vector<1x16xf32> to vector<8x16xf32>
      %175 = arith.subf %171, %174 : vector<8x16xf32>
      %176 = math.exp %175 : vector<8x16xf32>
      %cst_58 = arith.constant dense<0.000000e+00> : vector<16xf32>
      %177 = vector.multi_reduction <add>, %176, %cst_58 [0] : vector<8x16xf32> to vector<16xf32>
      %178 = vector.shape_cast %177 : vector<16xf32> to vector<1x16xf32>
      %179 = math.log %178 : vector<1x16xf32>
      %180 = arith.addf %173, %179 : vector<1x16xf32>
      %181 = arith.subf %21, %180 : vector<1x16xf32>
      %182 = vector.broadcast %181 : vector<1x16xf32> to vector<8x16xf32>
      %183 = arith.addf %19, %182 : vector<8x16xf32>
      %cst_59 = arith.constant dense<0xFF800000> : vector<8xf32>
      %184 = vector.multi_reduction <maximumf>, %183, %cst_59 [1] : vector<8x16xf32> to vector<8xf32>
      %185 = vector.shape_cast %184 : vector<8xf32> to vector<8x1xf32>
      %186 = vector.broadcast %185 : vector<8x1xf32> to vector<8x16xf32>
      %187 = arith.subf %183, %186 : vector<8x16xf32>
      %188 = math.exp %187 : vector<8x16xf32>
      %cst_60 = arith.constant dense<0.000000e+00> : vector<8xf32>
      %189 = vector.multi_reduction <add>, %188, %cst_60 [1] : vector<8x16xf32> to vector<8xf32>
      %190 = vector.shape_cast %189 : vector<8xf32> to vector<8x1xf32>
      %191 = math.log %190 : vector<8x1xf32>
      %192 = arith.addf %185, %191 : vector<8x1xf32>
      %193 = arith.subf %20, %192 : vector<8x1xf32>
      %194 = vector.broadcast %193 : vector<8x1xf32> to vector<8x16xf32>
      %195 = arith.addf %19, %194 : vector<8x16xf32>
      %cst_61 = arith.constant dense<0xFF800000> : vector<16xf32>
      %196 = vector.multi_reduction <maximumf>, %195, %cst_61 [0] : vector<8x16xf32> to vector<16xf32>
      %197 = vector.shape_cast %196 : vector<16xf32> to vector<1x16xf32>
      %198 = vector.broadcast %197 : vector<1x16xf32> to vector<8x16xf32>
      %199 = arith.subf %195, %198 : vector<8x16xf32>
      %200 = math.exp %199 : vector<8x16xf32>
      %cst_62 = arith.constant dense<0.000000e+00> : vector<16xf32>
      %201 = vector.multi_reduction <add>, %200, %cst_62 [0] : vector<8x16xf32> to vector<16xf32>
      %202 = vector.shape_cast %201 : vector<16xf32> to vector<1x16xf32>
      %203 = math.log %202 : vector<1x16xf32>
      %204 = arith.addf %197, %203 : vector<1x16xf32>
      %205 = arith.subf %21, %204 : vector<1x16xf32>
      %206 = vector.broadcast %205 : vector<1x16xf32> to vector<8x16xf32>
      %207 = arith.addf %19, %206 : vector<8x16xf32>
      %cst_63 = arith.constant dense<0xFF800000> : vector<8xf32>
      %208 = vector.multi_reduction <maximumf>, %207, %cst_63 [1] : vector<8x16xf32> to vector<8xf32>
      %209 = vector.shape_cast %208 : vector<8xf32> to vector<8x1xf32>
      %210 = vector.broadcast %209 : vector<8x1xf32> to vector<8x16xf32>
      %211 = arith.subf %207, %210 : vector<8x16xf32>
      %212 = math.exp %211 : vector<8x16xf32>
      %cst_64 = arith.constant dense<0.000000e+00> : vector<8xf32>
      %213 = vector.multi_reduction <add>, %212, %cst_64 [1] : vector<8x16xf32> to vector<8xf32>
      %214 = vector.shape_cast %213 : vector<8xf32> to vector<8x1xf32>
      %215 = math.log %214 : vector<8x1xf32>
      %216 = arith.addf %209, %215 : vector<8x1xf32>
      %217 = arith.subf %20, %216 : vector<8x1xf32>
      %218 = vector.broadcast %217 : vector<8x1xf32> to vector<8x16xf32>
      %219 = arith.addf %19, %218 : vector<8x16xf32>
      %cst_65 = arith.constant dense<0xFF800000> : vector<16xf32>
      %220 = vector.multi_reduction <maximumf>, %219, %cst_65 [0] : vector<8x16xf32> to vector<16xf32>
      %221 = vector.shape_cast %220 : vector<16xf32> to vector<1x16xf32>
      %222 = vector.broadcast %221 : vector<1x16xf32> to vector<8x16xf32>
      %223 = arith.subf %219, %222 : vector<8x16xf32>
      %224 = math.exp %223 : vector<8x16xf32>
      %cst_66 = arith.constant dense<0.000000e+00> : vector<16xf32>
      %225 = vector.multi_reduction <add>, %224, %cst_66 [0] : vector<8x16xf32> to vector<16xf32>
      %226 = vector.shape_cast %225 : vector<16xf32> to vector<1x16xf32>
      %227 = math.log %226 : vector<1x16xf32>
      %228 = arith.addf %221, %227 : vector<1x16xf32>
      %229 = arith.subf %21, %228 : vector<1x16xf32>
      %230 = vector.broadcast %229 : vector<1x16xf32> to vector<8x16xf32>
      %231 = arith.addf %19, %230 : vector<8x16xf32>
      %cst_67 = arith.constant dense<0xFF800000> : vector<8xf32>
      %232 = vector.multi_reduction <maximumf>, %231, %cst_67 [1] : vector<8x16xf32> to vector<8xf32>
      %233 = vector.shape_cast %232 : vector<8xf32> to vector<8x1xf32>
      %234 = vector.broadcast %233 : vector<8x1xf32> to vector<8x16xf32>
      %235 = arith.subf %231, %234 : vector<8x16xf32>
      %236 = math.exp %235 : vector<8x16xf32>
      %cst_68 = arith.constant dense<0.000000e+00> : vector<8xf32>
      %237 = vector.multi_reduction <add>, %236, %cst_68 [1] : vector<8x16xf32> to vector<8xf32>
      %238 = vector.shape_cast %237 : vector<8xf32> to vector<8x1xf32>
      %239 = math.log %238 : vector<8x1xf32>
      %240 = arith.addf %233, %239 : vector<8x1xf32>
      %241 = arith.subf %20, %240 : vector<8x1xf32>
      %242 = vector.broadcast %241 : vector<8x1xf32> to vector<8x16xf32>
      %243 = arith.addf %19, %242 : vector<8x16xf32>
      %cst_69 = arith.constant dense<0xFF800000> : vector<16xf32>
      %244 = vector.multi_reduction <maximumf>, %243, %cst_69 [0] : vector<8x16xf32> to vector<16xf32>
      %245 = vector.shape_cast %244 : vector<16xf32> to vector<1x16xf32>
      %246 = vector.broadcast %245 : vector<1x16xf32> to vector<8x16xf32>
      %247 = arith.subf %243, %246 : vector<8x16xf32>
      %248 = math.exp %247 : vector<8x16xf32>
      %cst_70 = arith.constant dense<0.000000e+00> : vector<16xf32>
      %249 = vector.multi_reduction <add>, %248, %cst_70 [0] : vector<8x16xf32> to vector<16xf32>
      %250 = vector.shape_cast %249 : vector<16xf32> to vector<1x16xf32>
      %251 = math.log %250 : vector<1x16xf32>
      %252 = arith.addf %245, %251 : vector<1x16xf32>
      %253 = arith.subf %21, %252 : vector<1x16xf32>
      %254 = vector.broadcast %253 : vector<1x16xf32> to vector<8x16xf32>
      %255 = arith.addf %19, %254 : vector<8x16xf32>
      %cst_71 = arith.constant dense<0xFF800000> : vector<8xf32>
      %256 = vector.multi_reduction <maximumf>, %255, %cst_71 [1] : vector<8x16xf32> to vector<8xf32>
      %257 = vector.shape_cast %256 : vector<8xf32> to vector<8x1xf32>
      %258 = vector.broadcast %257 : vector<8x1xf32> to vector<8x16xf32>
      %259 = arith.subf %255, %258 : vector<8x16xf32>
      %260 = math.exp %259 : vector<8x16xf32>
      %cst_72 = arith.constant dense<0.000000e+00> : vector<8xf32>
      %261 = vector.multi_reduction <add>, %260, %cst_72 [1] : vector<8x16xf32> to vector<8xf32>
      %262 = vector.shape_cast %261 : vector<8xf32> to vector<8x1xf32>
      %263 = math.log %262 : vector<8x1xf32>
      %264 = arith.addf %257, %263 : vector<8x1xf32>
      %265 = arith.subf %20, %264 : vector<8x1xf32>
      %266 = vector.broadcast %265 : vector<8x1xf32> to vector<8x16xf32>
      %267 = arith.addf %19, %266 : vector<8x16xf32>
      %cst_73 = arith.constant dense<0xFF800000> : vector<16xf32>
      %268 = vector.multi_reduction <maximumf>, %267, %cst_73 [0] : vector<8x16xf32> to vector<16xf32>
      %269 = vector.shape_cast %268 : vector<16xf32> to vector<1x16xf32>
      %270 = vector.broadcast %269 : vector<1x16xf32> to vector<8x16xf32>
      %271 = arith.subf %267, %270 : vector<8x16xf32>
      %272 = math.exp %271 : vector<8x16xf32>
      %cst_74 = arith.constant dense<0.000000e+00> : vector<16xf32>
      %273 = vector.multi_reduction <add>, %272, %cst_74 [0] : vector<8x16xf32> to vector<16xf32>
      %274 = vector.shape_cast %273 : vector<16xf32> to vector<1x16xf32>
      %275 = math.log %274 : vector<1x16xf32>
      %276 = arith.addf %269, %275 : vector<1x16xf32>
      %277 = arith.subf %21, %276 : vector<1x16xf32>
      %278 = vector.broadcast %277 : vector<1x16xf32> to vector<8x16xf32>
      %279 = arith.addf %19, %278 : vector<8x16xf32>
      %cst_75 = arith.constant dense<0xFF800000> : vector<8xf32>
      %280 = vector.multi_reduction <maximumf>, %279, %cst_75 [1] : vector<8x16xf32> to vector<8xf32>
      %281 = vector.shape_cast %280 : vector<8xf32> to vector<8x1xf32>
      %282 = vector.broadcast %281 : vector<8x1xf32> to vector<8x16xf32>
      %283 = arith.subf %279, %282 : vector<8x16xf32>
      %284 = math.exp %283 : vector<8x16xf32>
      %cst_76 = arith.constant dense<0.000000e+00> : vector<8xf32>
      %285 = vector.multi_reduction <add>, %284, %cst_76 [1] : vector<8x16xf32> to vector<8xf32>
      %286 = vector.shape_cast %285 : vector<8xf32> to vector<8x1xf32>
      %287 = math.log %286 : vector<8x1xf32>
      %288 = arith.addf %281, %287 : vector<8x1xf32>
      %289 = arith.subf %20, %288 : vector<8x1xf32>
      %290 = vector.broadcast %289 : vector<8x1xf32> to vector<8x16xf32>
      %291 = arith.addf %19, %290 : vector<8x16xf32>
      %cst_77 = arith.constant dense<0xFF800000> : vector<16xf32>
      %292 = vector.multi_reduction <maximumf>, %291, %cst_77 [0] : vector<8x16xf32> to vector<16xf32>
      %293 = vector.shape_cast %292 : vector<16xf32> to vector<1x16xf32>
      %294 = vector.broadcast %293 : vector<1x16xf32> to vector<8x16xf32>
      %295 = arith.subf %291, %294 : vector<8x16xf32>
      %296 = math.exp %295 : vector<8x16xf32>
      %cst_78 = arith.constant dense<0.000000e+00> : vector<16xf32>
      %297 = vector.multi_reduction <add>, %296, %cst_78 [0] : vector<8x16xf32> to vector<16xf32>
      %298 = vector.shape_cast %297 : vector<16xf32> to vector<1x16xf32>
      %299 = math.log %298 : vector<1x16xf32>
      %300 = arith.addf %293, %299 : vector<1x16xf32>
      %301 = arith.subf %21, %300 : vector<1x16xf32>
      %c0_79 = arith.constant 0 : index
      %c0_80 = arith.constant 0 : index
      %302 = vector.load %arg7[%c0_79, %c0_80] : memref<8x1xf32, #tpu.memory_space<vmem>>, vector<8x1xf32>
      tpu.vector_store %arg7[%c0_79, %c0_80], %289 {strides = array<i32>} : memref<8x1xf32, #tpu.memory_space<vmem>>, vector<8x1xf32>,
      %c0_81 = arith.constant 0 : index
      %c0_82 = arith.constant 0 : index
      %303 = vector.load %arg8[%c0_81, %c0_82] : memref<1x16xf32, #tpu.memory_space<vmem>>, vector<1x16xf32>
      tpu.vector_store %arg8[%c0_81, %c0_82], %301 {strides = array<i32>} : memref<1x16xf32, #tpu.memory_space<vmem>>, vector<1x16xf32>,
      %304 = arith.subf %289, %60 : vector<8x1xf32>
      %305 = math.absf %304 : vector<8x1xf32>
      %cst_83 = arith.constant dense<0xFF800000> : vector<1xf32>
      %306 = vector.multi_reduction <maximumf>, %305, %cst_83 [0] : vector<8x1xf32> to vector<1xf32>
      %307 = vector.shape_cast %306 : vector<1xf32> to vector<1x1xf32>
      %cst_84 = arith.constant 9.99999997E-7 : f32
      %308 = vector.broadcast %cst_84 : f32 to vector<1x1xf32>
      %309 = arith.cmpf ogt, %307, %308 : vector<1x1xf32>
      %310 = arith.extui %309 : vector<1x1xi1> to vector<1x1xi32>
      %c0_85 = arith.constant 0 : index
      %c0_86 = arith.constant 0 : index
      %311 = vector.load %arg9[%c0_85, %c0_86] : memref<1x1xi32, #tpu.memory_space<vmem>>, vector<1x1xi32>
      tpu.vector_store %arg9[%c0_85, %c0_86], %310 {strides = array<i32>} : memref<1x1xi32, #tpu.memory_space<vmem>>, vector<1x1xi32>,
      %c1_i32_87 = arith.constant 1 : i32
      %312 = arith.addi %arg10, %c1_i32_87 : i32
      %c0_88 = arith.constant 0 : index
      %c0_89 = arith.constant 0 : index
      %313 = vector.load %arg9[%c0_88, %c0_89] : memref<1x1xi32, #tpu.memory_space<vmem>>, vector<1x1xi32>
      %314 = vector.extract %313[0, 0] : i32 from vector<1x1xi32>
      scf.yield %312, %314 : i32, i32
    }
    %c0_20 = arith.constant 0 : index
    %c0_21 = arith.constant 0 : index
    %27 = vector.load %arg7[%c0_20, %c0_21] : memref<8x1xf32, #tpu.memory_space<vmem>>, vector<8x1xf32>
    %c0_22 = arith.constant 0 : index
    %c0_23 = arith.constant 0 : index
    %28 = vector.load %arg8[%c0_22, %c0_23] : memref<1x16xf32, #tpu.memory_space<vmem>>, vector<1x16xf32>
    %29 = vector.broadcast %27 : vector<8x1xf32> to vector<8x16xf32>
    %30 = arith.addf %19, %29 : vector<8x16xf32>
    %31 = vector.broadcast %28 : vector<1x16xf32> to vector<8x16xf32>
    %32 = arith.addf %30, %31 : vector<8x16xf32>
    %33 = math.exp %32 : vector<8x16xf32>
    %cst_24 = arith.constant dense<0.000000e+00> : vector<32x8xf32>
    %34 = tpu.matmul %1, %33, %cst_24 {dimension_numbers = #tpu.dot_dimension_numbers<[1], [1], [0], [0], [0, 0, 1, 0], [], []>} : vector<32x16xf32>, vector<8x16xf32>, vector<32x8xf32> -> vector<32x8xf32>
    %35 = vector.broadcast %3 : vector<1x8xf32> to vector<32x8xf32>
    %36 = arith.mulf %35, %0 : vector<32x8xf32>
    %37 = arith.subf %36, %34 : vector<32x8xf32>
    %38 = arith.mulf %37, %37 : vector<32x8xf32>
    %cst_25 = arith.constant dense<0.000000e+00> : vector<8xf32>
    %39 = vector.multi_reduction <add>, %38, %cst_25 [0] : vector<32x8xf32> to vector<8xf32>
    %40 = vector.shape_cast %39 : vector<8xf32> to vector<1x8xf32>
    %41 = math.sqrt %40 : vector<1x8xf32>
    %cst_26 = arith.constant dense<0.000000e+00> : vector<1xf32>
    %42 = vector.multi_reduction <add>, %41, %cst_26 [1] : vector<1x8xf32> to vector<1xf32>
    %43 = vector.shape_cast %42 : vector<1xf32> to vector<1x1xf32>
    %c0_27 = arith.constant 0 : index
    %44 = memref.load %arg5[%c0_27] : memref<1xf32, #tpu.memory_space<smem>>
    %cst_28 = arith.constant 5.000000e-01 : f32
    %45 = arith.mulf %cst_28, %44 : f32
    %46 = vector.broadcast %45 : f32 to vector<1x1xf32>
    %47 = arith.mulf %46, %43 : vector<1x1xf32>
    %48 = arith.mulf %47, %43 : vector<1x1xf32>
    %cst_29 = arith.constant 1.000000e+00 : f32
    %49 = arith.subf %cst_29, %44 : f32
    %cst_30 = arith.constant 5.000000e-01 : f32
    %50 = arith.mulf %cst_30, %49 : f32
    %cst_31 = arith.constant 0.699999988 : f32
    %51 = vector.broadcast %cst_31 : f32 to vector<1x1xf32>
    %52 = arith.subf %51, %43 : vector<1x1xf32>
    %cst_32 = arith.constant 0.000000e+00 : f32
    %53 = vector.broadcast %cst_32 : f32 to vector<1x1xf32>
    %54 = arith.maximumf %52, %53 : vector<1x1xf32>
    %55 = arith.mulf %54, %54 : vector<1x1xf32>
    %56 = vector.broadcast %50 : f32 to vector<1x1xf32>
    %57 = arith.mulf %56, %55 : vector<1x1xf32>
    %58 = arith.addf %48, %57 : vector<1x1xf32>
    %c0_33 = arith.constant 0 : index
    %c0_34 = arith.constant 0 : index
    %59 = vector.load %arg6[%c0_33, %c0_34] : memref<1x1xf32, #tpu.memory_space<vmem>>, vector<1x1xf32>
    tpu.vector_store %arg6[%c0_33, %c0_34], %58 {strides = array<i32>} : memref<1x1xf32, #tpu.memory_space<vmem>>, vector<1x1xf32>,
    return
  }
}

</mosaic_0001>

<bundles_post_ra>
// kernel: tpu_custom_call.1
= control target key start
LH: loop header
LB: loop body
LE: loop exit
PB: predicated region body
PF: predicated region fallthrough
CT: control target
= control target key end

     0   :  { %s1472_s0 = inlined_call_operand.vmem [shape: f32[32,8], index: 0, kind: input, shape index: {}]   ;;  %s1473_s1 = inlined_call_operand.vmem [shape: f32[32,16], index: 1, kind: input, shape index: {}]   ;;  %s1474_s2 = inlined_call_operand.vmem [shape: f32[8,1], index: 2, kind: input, shape index: {}]   ;;  %s1475_s3 = inlined_call_operand.vmem [shape: f32[1,8], index: 3, kind: input, shape index: {}]   ;;  %s1476_s4 = inlined_call_operand.vmem [shape: f32[1,16], index: 4, kind: input, shape index: {}]   ;;  %s1477_s5 = inlined_call_operand.<no memory space> [shape: f32[1], index: 5, kind: input, shape index: {}]   ;;  %s1478_s6 = inlined_call_operand.hbm [shape: f32[1,1], index: 6, kind: output, shape index: {}]  }
   0x1   :  { %11 = sst [smem:[#allocation5]] %s1477_s5 }
   0x2   :  { %v1237_v0 = vld [vmem:[%s1472_s0] sm:$0xff]  ;;  %v1242_v1 = vld [vmem:[%s1472_s0 + $0x8] sm:$0xff]  ;;  %v1189_v3 = vmov 0.0|0.0  }
   0x3   :  { %v142_v2 = vmul.f32 %v1237_v0, %v1237_v0  ;;  %1042 = vmatprep.subr.bf16.mxu1 %v1189_v3  ;;  %36 = vxpose.xlu1.b32.start [1/4] (short) (narrow) %v1237_v0, 8 }
   0x4   :  { %12 = vsyncpa [#allocation7], 0  ;;  %v1190_v4 = vmov 1.0|1.0   ;;  %vm282_vm0 = vcmask 7168   ;;  %vm284_vm1 = vcmask 122880   ;;  %1036 = vmatprep.subr.bf16.mxu0 %v1189_v3  ;;  %v143_v5 = vmul.f32 %v1242_v1, %v1242_v1 }
   0x5   :  { %1043 = vmatpush3.bf16.msra.mxu1 %v1190_v4  ;;  %146 = vxpose.xlu0.b32.start [1/4] (short) (narrow) %v142_v2, 8  ;;  %v1191_v6 = vmov 0.0   ;;  %v1254_v7 = vld [vmem:[%s1472_s0 + $0x10] sm:$0xff]  ;;  %vm1192_vm2 = vmmov 0   ;;  %v1259_v8 = vld [vmem:[%s1475_s3] ss:$0 sm:$0xff] }
   0x6   :  { %1044 = vmatprep.subr.bf16.mxu1 %v1189_v3  ;;  %283 = vst.msk [vmem:[#allocation2] sm:$0xff] %vm282_vm0, %v1191_v6  ;;  %1025 = vmatprep.mubr.msk.f32.mxu1 %vm1192_vm2, %v1191_v6  ;;  %v1265_v9 = vld [vmem:[%s1473_s1] sm:$0xff]  ;;  %v1270_v10 = vld [vmem:[%s1473_s1 + $0x8] sm:$0xff]  ;;  %vm255_vm3 = vcmask 130048   ;;  %v1275_v11 = vld [vmem:[%s1473_s1 + $0x10] sm:$0xff]  ;;  %v144_v17 = vmul.f32 %v1254_v7, %v1254_v7  ;;  %v1193_v26 = vmov 0  }
   0x7   :  { %285 = vst.msk [vmem:[#allocation3] sm:$0x1] %vm284_vm1, %v1191_v6  ;;  %1014 = vmatprep.mubr.msk.f32.mxu0 %vm1192_vm2, %v1191_v6  ;;  %37 = vxpose.xlu1.b32.cont [2/4] (short) (narrow) %v1242_v1, 8  ;;  %v1037_v12 = vpack.c.bf16 %v1270_v10, %v1265_v9  ;;  %v251_v13 = vmul.f32 %v1265_v9, %v1265_v9  ;;  %v1286_v15 = vld [vmem:[%s1473_s1 + $0x18] sm:$0xff]  ;;  %vm68_vm4 = vcmask 261120   ;;  %v33_v32 = vld [vmem:[%s1474_s2] sm:$0xff] }
   0x8   :  { %v252_v14 = vmul.f32 %v1270_v10, %v1270_v10  ;;  %v253_v16 = vmul.f32 %v1275_v11, %v1275_v11  ;;  %v1295_v18 = vld [vmem:[%s1472_s0 + $0x18] sm:$0xff]  ;;  %v1040_v21 = vpack.c.bf16 %v1286_v15, %v1275_v11  ;;  %v254_v29 = vmul.f32 %v1286_v15, %v1286_v15  ;;  %v35_v33 = vld [vmem:[%s1476_s4] sm:$0x1]  ;;  %s1322_s2 = smov 0  }
   0x9   :  { %1045 = vmatpush3.bf16.msra.mxu1 %v1190_v4  ;;  %147 = vxpose.xlu0.b32.cont [2/4] (short) (narrow) %v143_v5, 8  ;;  %v256_v19 = vsel %vm255_vm3, %v251_v13, 0.0  ;;  %v145_v24 = vmul.f32 %v1295_v18, %v1295_v18  ;;  %1066 = vlog2.f32 %v33_v32 }
   0xa   :  { %1038 = vmatpush3.bf16.msra.mxu0 %v1037_v12  ;;  %v257_v20 = vsel %vm255_vm3, %v252_v14, 0.0  ;;  %v259_v22 = vsel %vm255_vm3, %v253_v16, 0.0  ;;  %v261_v30 = vsel %vm255_vm3, %v254_v29, 0.0  ;;  %1068 = vlog2.f32 %v35_v33 }
   0xb   :  { %38 = vxpose.xlu1.b32.cont [3/4] (short) (narrow) %v1254_v7, 8  ;;  %v258_v23 = vadd.f32 %v257_v20, %v256_v19  ;;  %1039 = vmatprep.subr.bf16.mxu0 %v1189_v3 }
   0xd   :  { %148 = vxpose.xlu0.b32.cont [3/4] (short) (narrow) %v144_v17, 8  ;;  %v260_v25 = vadd.f32 %v259_v22, %v258_v23 }
   0xe   :  { %1041 = vmatpush3.bf16.msra.mxu0 %v1040_v21 }
   0xf   :  { %39 = vxpose.xlu1.b32.end [4/4] (short) (narrow) %v1295_v18, 8  ;;  %v262_v31 = vadd.f32 %v261_v30, %v260_v25 }
  0x11   :  { %149 = vxpose.xlu0.b32.end [4/4] (short) (narrow) %v145_v24, 8  ;;  %v263_v42 = vrot.slane %v262_v31, 4 }
  0x13   :  { %v1067_v38 = vpop.eup %1066  ;;  %v264_v43 = vadd.f32 %v263_v42, %v262_v31 }
  0x14   :  { %v1069_v39 = vpop.eup %1068  ;;  %v1316_v40 = vmul.f32 0.6931472, %v1067_v38 }
  0x15   :  { %v1318_v41 = vmul.f32 0.6931472, %v1069_v39  ;;  %v265_v44 = vrot.slane %v264_v43, 2 }
  0x17   :  { %v266_v45 = vadd.f32 %v265_v44, %v264_v43 }
  0x19   :  { %v267_v46 = vrot.slane %v266_v45, 1 }
  0x1b   :  { %v268_v47 = vadd.f32 %v267_v46, %v266_v45 }
  0x3a   :  { %1065 = vset.pattern.permute.xlu0 %v1193_v26 }
  0x83   :  { %v52_v27 = vpop.trf.xlu1 }
  0x84   :  { %1015 = vmatmul.mubr.msk.f32.vlgmr.msra.gmra.mrb[0].mxu0 %vm68_vm4, %v52_v27 }
  0x85   :  { %v162_v28 = vpop.trf.xlu0 }
  0x86   :  { %1026 = vmatmul.mubr.msk.f32.vlgmr.msra.gmra.mrb[0].mxu1 %vm68_vm4, %v162_v28 }
 0x157   :  { %v138_v34 = vpop.f32.mrb[0].mxu0 }
 0x158   :  { %v1016_v35 = vpop.f32.mrb[1].mxu0  ;;  %v275_v48 = vmul.f32 2.0, %v138_v34 }
 0x159   :  { %v247_v36 = vpop.f32.mrb[0].mxu1 }
 0x15a   :  { %271 = vperm.xlu0 %1065, %v247_v36   ;;  %v1027_v37 = vpop.f32.mrb[1].mxu1 }
 0x1d9   :  { %v272_v49 = vpop.permute.xlu0 %271 }
 0x1da   :  { %v274_v50 = vadd.f32 %v272_v49, %v268_v47 }
 0x1dc   :  { %v276_v51 = vsub.f32 %v274_v50, %v275_v48 }
 0x1de   :  { %v1320_v52 = vmax.f32 %v276_v51, 0.0 }
 0x1df LB: > { %v983_v53 = vld [vmem:[#allocation3] ss:$0 sm:$0xff]  ;;  %v1194_v61 = vmov 0   ;;  %v345_v32 = vlaneseq  ;;  %s782_s4 = sadd.s32 1, %s1187_s2   ;;  %vm780_vm5 = vcmask 0   ;;  %s1187_s2 = sphi %s1322_s2, %s1479_s2  }
 0x1e0   : > { %v303_v54 = vadd.f32 %v983_v53, %v1320_v52  ;;  %1070 = vset.pattern.permute.xlu1 %v1194_v61  ;;  %1071 = vset.pattern.permute.xlu0 %v1194_v61  ;;  %p289_p0 = scmp.lt.s32.totalorder %s782_s4, 25  ;;  %s1479_s2 = smov %s782_s4 }
 0x1e1   : > { %v346_v33 = vshrl.u32 %v345_v32, 7 }
 0x1e2   : > { %v304_v55 = vsel %vm255_vm3, %v303_v54, -inf }
 0x1e3   : > { %305 = vmax.xlane.f32.xlu0 %v304_v55  ;;  %v1336_v37 = vsub.s32 0, %v346_v33 }
 0x270   : > { %v306_v56 = vpop.xlane.xlu0 %305 }
 0x271   : > { %v307_v57 = vsub.f32 %v303_v54, %v306_v56 }
 0x273   : > { %v308_v58 = vmul.f32 1.442695, %v307_v57 }
 0x275   : > { %1072 = vpow2.f32 %v308_v58 }
 0x27f   : > { %v1073_v59 = vpop.eup %1072 }
 0x280   : > { %v310_v60 = vsel %vm255_vm3, %v1073_v59, 0.0 }
 0x281   : > { %311 = vadd.xlane.f32.xlu0 %v310_v60 }
 0x30e   : > { %v312_v62 = vpop.xlane.xlu0 %311 }
 0x30f   : > { %1074 = vlog2.f32 %v312_v62 }
 0x319   : > { %v1075_v63 = vpop.eup %1074 }
 0x31a   : > { %v314_v2 = vmul.f32 0.6931472, %v1075_v63 }
 0x31c   : > { %v315_v3 = vadd.f32 %v314_v2, %v306_v56 }
 0x31e   : > { %v316_v4 = vsub.f32 %v1316_v40, %v315_v3 }
 0x320   : > { %319 = vperm.xlu1 %1070, %v316_v4  }
 0x39f   : > { %v320_v5 = vpop.permute.xlu1 %319 }
 0x3a0   : > { %v322_v6 = vadd.f32 %v320_v5, %v1320_v52 }
 0x3a2   : > { %v323_v12 = vsel %vm255_vm3, %v322_v6, -inf }
 0x3a3   : > { %v324_v13 = vrot.slane %v323_v12, 4 }
 0x3a5   : > { %v325_v14 = vmax.f32 %v323_v12, %v324_v13 }
 0x3a7   : > { %v326_v16 = vrot.slane %v325_v14, 2 }
 0x3a9   : > { %v327_v17 = vmax.f32 %v325_v14, %v326_v16 }
 0x3ab   : > { %v328_v19 = vrot.slane %v327_v17, 1 }
 0x3ad   : > { %v329_v20 = vmax.f32 %v327_v17, %v328_v19 }
 0x3af   : > { %v330_v21 = vsub.f32 %v322_v6, %v329_v20 }
 0x3b1   : > { %v331_v22 = vmul.f32 1.442695, %v330_v21 }
 0x3b3   : > { %1076 = vpow2.f32 %v331_v22 }
 0x3bd   : > { %v1077_v23 = vpop.eup %1076 }
 0x3be   : > { %v333_v24 = vsel %vm255_vm3, %v1077_v23, 0.0 }
 0x3bf   : > { %v334_v25 = vrot.slane %v333_v24, 4 }
 0x3c1   : > { %v335_v27 = vadd.f32 %v334_v25, %v333_v24 }
 0x3c3   : > { %v336_v28 = vrot.slane %v335_v27, 2 }
 0x3c5   : > { %v337_v29 = vadd.f32 %v336_v28, %v335_v27 }
 0x3c7   : > { %v338_v30 = vrot.slane %v337_v29, 1 }
 0x3c9   : > { %v339_v31 = vadd.f32 %v338_v30, %v337_v29 }
 0x3cb   : > { %1078 = vlog2.f32 %v339_v31 }
 0x3d5   : > { %v1079_v34 = vpop.eup %1078 }
 0x3d6   : > { %v341_v35 = vmul.f32 0.6931472, %v1079_v34 }
 0x3d8   : > { %v342_v36 = vadd.f32 %v341_v35, %v329_v20 }
 0x3da   : > { %v343_v38 = vsub.f32 %v1318_v41, %v342_v36 }
 0x3dc   : > { %v348_v39 = vrot.slane %v343_v38, %v1336_v37 }
 0x3de   : > { %v350_v42 = vadd.f32 %v348_v39, %v1320_v52 }
 0x3e0   : > { %v351_v43 = vsel %vm255_vm3, %v350_v42, -inf }
 0x3e1   : > { %352 = vmax.xlane.f32.xlu1 %v351_v43 }
 0x46e   : > { %v353_v44 = vpop.xlane.xlu1 %352 }
 0x46f   : > { %v354_v45 = vsub.f32 %v350_v42, %v353_v44 }
 0x471   : > { %v355_v46 = vmul.f32 1.442695, %v354_v45 }
 0x473   : > { %1080 = vpow2.f32 %v355_v46 }
 0x47d   : > { %v1081_v47 = vpop.eup %1080 }
 0x47e   : > { %v357_v48 = vsel %vm255_vm3, %v1081_v47, 0.0 }
 0x47f   : > { %358 = vadd.xlane.f32.xlu0 %v357_v48 }
 0x50c   : > { %v359_v49 = vpop.xlane.xlu0 %358 }
 0x50d   : > { %1082 = vlog2.f32 %v359_v49 }
 0x517   : > { %v1083_v50 = vpop.eup %1082 }
 0x518   : > { %v361_v51 = vmul.f32 0.6931472, %v1083_v50 }
 0x51a   : > { %v362_v53 = vadd.f32 %v361_v51, %v353_v44 }
 0x51c   : > { %v363_v54 = vsub.f32 %v1316_v40, %v362_v53 }
 0x51e   : > { %366 = vperm.xlu0 %1071, %v363_v54  }
 0x59d   : > { %v367_v55 = vpop.permute.xlu0 %366 }
 0x59e   : > { %v369_v56 = vadd.f32 %v367_v55, %v1320_v52 }
 0x5a0   : > { %v370_v57 = vsel %vm255_vm3, %v369_v56, -inf }
 0x5a1   : > { %v371_v58 = vrot.slane %v370_v57, 4 }
 0x5a3   : > { %v372_v59 = vmax.f32 %v370_v57, %v371_v58 }
 0x5a5   : > { %v373_v60 = vrot.slane %v372_v59, 2 }
 0x5a7   : > { %v374_v62 = vmax.f32 %v372_v59, %v373_v60 }
 0x5a9   : > { %v375_v63 = vrot.slane %v374_v62, 1 }
 0x5ab   : > { %v376_v2 = vmax.f32 %v374_v62, %v375_v63 }
 0x5ad   : > { %v377_v3 = vsub.f32 %v369_v56, %v376_v2 }
 0x5af   : > { %v378_v4 = vmul.f32 1.442695, %v377_v3 }
 0x5b1   : > { %1084 = vpow2.f32 %v378_v4 }
 0x5bb   : > { %v1085_v5 = vpop.eup %1084 }
 0x5bc   : > { %v380_v6 = vsel %vm255_vm3, %v1085_v5, 0.0 }
 0x5bd   : > { %v381_v12 = vrot.slane %v380_v6, 4 }
 0x5bf   : > { %v382_v13 = vadd.f32 %v381_v12, %v380_v6 }
 0x5c1   : > { %v383_v14 = vrot.slane %v382_v13, 2 }
 0x5c3   : > { %v384_v16 = vadd.f32 %v383_v14, %v382_v13 }
 0x5c5   : > { %v385_v17 = vrot.slane %v384_v16, 1 }
 0x5c7   : > { %v386_v19 = vadd.f32 %v385_v17, %v384_v16 }
 0x5c9   : > { %1086 = vlog2.f32 %v386_v19 }
 0x5d3   : > { %v1087_v20 = vpop.eup %1086 }
 0x5d4   : > { %v388_v21 = vmul.f32 0.6931472, %v1087_v20 }
 0x5d6   : > { %v389_v22 = vadd.f32 %v388_v21, %v376_v2 }
 0x5d8   : > { %v390_v23 = vsub.f32 %v1318_v41, %v389_v22 }
 0x5da   : > { %v395_v24 = vrot.slane %v390_v23, %v1336_v37 }
 0x5dc   : > { %v397_v25 = vadd.f32 %v395_v24, %v1320_v52 }
 0x5de   : > { %v398_v27 = vsel %vm255_vm3, %v397_v25, -inf }
 0x5df   : > { %399 = vmax.xlane.f32.xlu1 %v398_v27 }
 0x66c   : > { %v400_v28 = vpop.xlane.xlu1 %399 }
 0x66d   : > { %v401_v29 = vsub.f32 %v397_v25, %v400_v28 }
 0x66f   : > { %v402_v30 = vmul.f32 1.442695, %v401_v29 }
 0x671   : > { %1088 = vpow2.f32 %v402_v30 }
 0x67b   : > { %v1089_v31 = vpop.eup %1088 }
 0x67c   : > { %v404_v32 = vsel %vm255_vm3, %v1089_v31, 0.0 }
 0x67d   : > { %405 = vadd.xlane.f32.xlu1 %v404_v32 }
 0x70a   : > { %v406_v33 = vpop.xlane.xlu1 %405 }
 0x70b   : > { %1090 = vlog2.f32 %v406_v33 }
 0x715   : > { %v1091_v34 = vpop.eup %1090 }
 0x716   : > { %v408_v35 = vmul.f32 0.6931472, %v1091_v34 }
 0x718   : > { %v409_v36 = vadd.f32 %v408_v35, %v400_v28 }
 0x71a   : > { %v410_v38 = vsub.f32 %v1316_v40, %v409_v36 }
 0x71c   : > { %413 = vperm.xlu1 %1070, %v410_v38  }
 0x79b   : > { %v414_v39 = vpop.permute.xlu1 %413 }
 0x79c   : > { %v416_v42 = vadd.f32 %v414_v39, %v1320_v52 }
 0x79e   : > { %v417_v43 = vsel %vm255_vm3, %v416_v42, -inf }
 0x79f   : > { %v418_v44 = vrot.slane %v417_v43, 4 }
 0x7a1   : > { %v419_v45 = vmax.f32 %v417_v43, %v418_v44 }
 0x7a3   : > { %v420_v46 = vrot.slane %v419_v45, 2 }
 0x7a5   : > { %v421_v47 = vmax.f32 %v419_v45, %v420_v46 }
 0x7a7   : > { %v422_v48 = vrot.slane %v421_v47, 1 }
 0x7a9   : > { %v423_v49 = vmax.f32 %v421_v47, %v422_v48 }
 0x7ab   : > { %v424_v50 = vsub.f32 %v416_v42, %v423_v49 }
 0x7ad   : > { %v425_v51 = vmul.f32 1.442695, %v424_v50 }
 0x7af   : > { %1092 = vpow2.f32 %v425_v51 }
 0x7b9   : > { %v1093_v53 = vpop.eup %1092 }
 0x7ba   : > { %v427_v54 = vsel %vm255_vm3, %v1093_v53, 0.0 }
 0x7bb   : > { %v428_v55 = vrot.slane %v427_v54, 4 }
 0x7bd   : > { %v429_v56 = vadd.f32 %v428_v55, %v427_v54 }
 0x7bf   : > { %v430_v57 = vrot.slane %v429_v56, 2 }
 0x7c1   : > { %v431_v58 = vadd.f32 %v430_v57, %v429_v56 }
 0x7c3   : > { %v432_v59 = vrot.slane %v431_v58, 1 }
 0x7c5   : > { %v433_v60 = vadd.f32 %v432_v59, %v431_v58 }
 0x7c7   : > { %1094 = vlog2.f32 %v433_v60 }
 0x7d1   : > { %v1095_v62 = vpop.eup %1094 }
 0x7d2   : > { %v435_v63 = vmul.f32 0.6931472, %v1095_v62 }
 0x7d4   : > { %v436_v2 = vadd.f32 %v435_v63, %v423_v49 }
 0x7d6   : > { %v437_v3 = vsub.f32 %v1318_v41, %v436_v2 }
 0x7d8   : > { %v442_v4 = vrot.slane %v437_v3, %v1336_v37 }
 0x7da   : > { %v444_v5 = vadd.f32 %v442_v4, %v1320_v52 }
 0x7dc   : > { %v445_v6 = vsel %vm255_vm3, %v444_v5, -inf }
 0x7dd   : > { %446 = vmax.xlane.f32.xlu0 %v445_v6 }
 0x86a   : > { %v447_v12 = vpop.xlane.xlu0 %446 }
 0x86b   : > { %v448_v13 = vsub.f32 %v444_v5, %v447_v12 }
 0x86d   : > { %v449_v14 = vmul.f32 1.442695, %v448_v13 }
 0x86f   : > { %1096 = vpow2.f32 %v449_v14 }
 0x879   : > { %v1097_v16 = vpop.eup %1096 }
 0x87a   : > { %v451_v17 = vsel %vm255_vm3, %v1097_v16, 0.0 }
 0x87b   : > { %452 = vadd.xlane.f32.xlu1 %v451_v17 }
 0x908   : > { %v453_v19 = vpop.xlane.xlu1 %452 }
 0x909   : > { %1098 = vlog2.f32 %v453_v19 }
 0x913   : > { %v1099_v20 = vpop.eup %1098 }
 0x914   : > { %v455_v21 = vmul.f32 0.6931472, %v1099_v20 }
 0x916   : > { %v456_v22 = vadd.f32 %v455_v21, %v447_v12 }
 0x918   : > { %v457_v23 = vsub.f32 %v1316_v40, %v456_v22 }
 0x91a   : > { %460 = vperm.xlu0 %1071, %v457_v23  }
 0x999   : > { %v461_v24 = vpop.permute.xlu0 %460 }
 0x99a   : > { %v463_v25 = vadd.f32 %v461_v24, %v1320_v52 }
 0x99c   : > { %v464_v27 = vsel %vm255_vm3, %v463_v25, -inf }
 0x99d   : > { %v465_v28 = vrot.slane %v464_v27, 4 }
 0x99f   : > { %v466_v29 = vmax.f32 %v464_v27, %v465_v28 }
 0x9a1   : > { %v467_v30 = vrot.slane %v466_v29, 2 }
 0x9a3   : > { %v468_v31 = vmax.f32 %v466_v29, %v467_v30 }
 0x9a5   : > { %v469_v32 = vrot.slane %v468_v31, 1 }
 0x9a7   : > { %v470_v33 = vmax.f32 %v468_v31, %v469_v32 }
 0x9a9   : > { %v471_v34 = vsub.f32 %v463_v25, %v470_v33 }
 0x9ab   : > { %v472_v35 = vmul.f32 1.442695, %v471_v34 }
 0x9ad   : > { %1100 = vpow2.f32 %v472_v35 }
 0x9b7   : > { %v1101_v36 = vpop.eup %1100 }
 0x9b8   : > { %v474_v38 = vsel %vm255_vm3, %v1101_v36, 0.0 }
 0x9b9   : > { %v475_v39 = vrot.slane %v474_v38, 4 }
 0x9bb   : > { %v476_v42 = vadd.f32 %v475_v39, %v474_v38 }
 0x9bd   : > { %v477_v43 = vrot.slane %v476_v42, 2 }
 0x9bf   : > { %v478_v44 = vadd.f32 %v477_v43, %v476_v42 }
 0x9c1   : > { %v479_v45 = vrot.slane %v478_v44, 1 }
 0x9c3   : > { %v480_v46 = vadd.f32 %v479_v45, %v478_v44 }
 0x9c5   : > { %1102 = vlog2.f32 %v480_v46 }
 0x9cf   : > { %v1103_v47 = vpop.eup %1102 }
 0x9d0   : > { %v482_v48 = vmul.f32 0.6931472, %v1103_v47 }
 0x9d2   : > { %v483_v49 = vadd.f32 %v482_v48, %v470_v33 }
 0x9d4   : > { %v484_v50 = vsub.f32 %v1318_v41, %v483_v49 }
 0x9d6   : > { %v489_v51 = vrot.slane %v484_v50, %v1336_v37 }
 0x9d8   : > { %v491_v53 = vadd.f32 %v489_v51, %v1320_v52 }
 0x9da   : > { %v492_v54 = vsel %vm255_vm3, %v491_v53, -inf }
 0x9db   : > { %493 = vmax.xlane.f32.xlu1 %v492_v54 }
 0xa68   : > { %v494_v55 = vpop.xlane.xlu1 %493 }
 0xa69   : > { %v495_v56 = vsub.f32 %v491_v53, %v494_v55 }
 0xa6b   : > { %v496_v57 = vmul.f32 1.442695, %v495_v56 }
 0xa6d   : > { %1104 = vpow2.f32 %v496_v57 }
 0xa77   : > { %v1105_v58 = vpop.eup %1104 }
 0xa78   : > { %v498_v59 = vsel %vm255_vm3, %v1105_v58, 0.0 }
 0xa79   : > { %499 = vadd.xlane.f32.xlu1 %v498_v59 }
 0xb06   : > { %v500_v60 = vpop.xlane.xlu1 %499 }
 0xb07   : > { %1106 = vlog2.f32 %v500_v60 }
 0xb11   : > { %v1107_v62 = vpop.eup %1106 }
 0xb12   : > { %v502_v63 = vmul.f32 0.6931472, %v1107_v62 }
 0xb14   : > { %v503_v2 = vadd.f32 %v502_v63, %v494_v55 }
 0xb16   : > { %v504_v3 = vsub.f32 %v1316_v40, %v503_v2 }
 0xb18   : > { %507 = vperm.xlu0 %1071, %v504_v3  }
 0xb97   : > { %v508_v4 = vpop.permute.xlu0 %507 }
 0xb98   : > { %v510_v5 = vadd.f32 %v508_v4, %v1320_v52 }
 0xb9a   : > { %v511_v6 = vsel %vm255_vm3, %v510_v5, -inf }
 0xb9b   : > { %v512_v12 = vrot.slane %v511_v6, 4 }
 0xb9d   : > { %v513_v13 = vmax.f32 %v511_v6, %v512_v12 }
 0xb9f   : > { %v514_v14 = vrot.slane %v513_v13, 2 }
 0xba1   : > { %v515_v16 = vmax.f32 %v513_v13, %v514_v14 }
 0xba3   : > { %v516_v17 = vrot.slane %v515_v16, 1 }
 0xba5   : > { %v517_v19 = vmax.f32 %v515_v16, %v516_v17 }
 0xba7   : > { %v518_v20 = vsub.f32 %v510_v5, %v517_v19 }
 0xba9   : > { %v519_v21 = vmul.f32 1.442695, %v518_v20 }
 0xbab   : > { %1108 = vpow2.f32 %v519_v21 }
 0xbb5   : > { %v1109_v22 = vpop.eup %1108 }
 0xbb6   : > { %v521_v23 = vsel %vm255_vm3, %v1109_v22, 0.0 }
 0xbb7   : > { %v522_v24 = vrot.slane %v521_v23, 4 }
 0xbb9   : > { %v523_v25 = vadd.f32 %v522_v24, %v521_v23 }
 0xbbb   : > { %v524_v27 = vrot.slane %v523_v25, 2 }
 0xbbd   : > { %v525_v28 = vadd.f32 %v524_v27, %v523_v25 }
 0xbbf   : > { %v526_v29 = vrot.slane %v525_v28, 1 }
 0xbc1   : > { %v527_v30 = vadd.f32 %v526_v29, %v525_v28 }
 0xbc3   : > { %1110 = vlog2.f32 %v527_v30 }
 0xbcd   : > { %v1111_v31 = vpop.eup %1110 }
 0xbce   : > { %v529_v32 = vmul.f32 0.6931472, %v1111_v31 }
 0xbd0   : > { %v530_v33 = vadd.f32 %v529_v32, %v517_v19 }
 0xbd2   : > { %v531_v34 = vsub.f32 %v1318_v41, %v530_v33 }
 0xbd4   : > { %v536_v35 = vrot.slane %v531_v34, %v1336_v37 }
 0xbd6   : > { %v538_v36 = vadd.f32 %v536_v35, %v1320_v52 }
 0xbd8   : > { %v539_v38 = vsel %vm255_vm3, %v538_v36, -inf }
 0xbd9   : > { %540 = vmax.xlane.f32.xlu1 %v539_v38 }
 0xc66   : > { %v541_v39 = vpop.xlane.xlu1 %540 }
 0xc67   : > { %v542_v42 = vsub.f32 %v538_v36, %v541_v39 }
 0xc69   : > { %v543_v43 = vmul.f32 1.442695, %v542_v42 }
 0xc6b   : > { %1112 = vpow2.f32 %v543_v43 }
 0xc75   : > { %v1113_v44 = vpop.eup %1112 }
 0xc76   : > { %v545_v45 = vsel %vm255_vm3, %v1113_v44, 0.0 }
 0xc77   : > { %546 = vadd.xlane.f32.xlu0 %v545_v45 }
 0xd04   : > { %v547_v46 = vpop.xlane.xlu0 %546 }
 0xd05   : > { %1114 = vlog2.f32 %v547_v46 }
 0xd0f   : > { %v1115_v47 = vpop.eup %1114 }
 0xd10   : > { %v549_v48 = vmul.f32 0.6931472, %v1115_v47 }
 0xd12   : > { %v550_v49 = vadd.f32 %v549_v48, %v541_v39 }
 0xd14   : > { %v551_v50 = vsub.f32 %v1316_v40, %v550_v49 }
 0xd16   : > { %554 = vperm.xlu1 %1070, %v551_v50  }
 0xd95   : > { %v555_v51 = vpop.permute.xlu1 %554 }
 0xd96   : > { %v557_v53 = vadd.f32 %v555_v51, %v1320_v52 }
 0xd98   : > { %v558_v54 = vsel %vm255_vm3, %v557_v53, -inf }
 0xd99   : > { %v559_v55 = vrot.slane %v558_v54, 4 }
 0xd9b   : > { %v560_v56 = vmax.f32 %v558_v54, %v559_v55 }
 0xd9d   : > { %v561_v57 = vrot.slane %v560_v56, 2 }
 0xd9f   : > { %v562_v58 = vmax.f32 %v560_v56, %v561_v57 }
 0xda1   : > { %v563_v59 = vrot.slane %v562_v58, 1 }
 0xda3   : > { %v564_v60 = vmax.f32 %v562_v58, %v563_v59 }
 0xda5   : > { %v565_v62 = vsub.f32 %v557_v53, %v564_v60 }
 0xda7   : > { %v566_v63 = vmul.f32 1.442695, %v565_v62 }
 0xda9   : > { %1116 = vpow2.f32 %v566_v63 }
 0xdb3   : > { %v1117_v2 = vpop.eup %1116 }
 0xdb4   : > { %v568_v3 = vsel %vm255_vm3, %v1117_v2, 0.0 }
 0xdb5   : > { %v569_v4 = vrot.slane %v568_v3, 4 }
 0xdb7   : > { %v570_v5 = vadd.f32 %v569_v4, %v568_v3 }
 0xdb9   : > { %v571_v6 = vrot.slane %v570_v5, 2 }
 0xdbb   : > { %v572_v12 = vadd.f32 %v571_v6, %v570_v5 }
 0xdbd   : > { %v573_v13 = vrot.slane %v572_v12, 1 }
 0xdbf   : > { %v574_v14 = vadd.f32 %v573_v13, %v572_v12 }
 0xdc1   : > { %1118 = vlog2.f32 %v574_v14 }
 0xdcb   : > { %v1119_v16 = vpop.eup %1118 }
 0xdcc   : > { %v576_v17 = vmul.f32 0.6931472, %v1119_v16 }
 0xdce   : > { %v577_v19 = vadd.f32 %v576_v17, %v564_v60 }
 0xdd0   : > { %v578_v20 = vsub.f32 %v1318_v41, %v577_v19 }
 0xdd2   : > { %v583_v21 = vrot.slane %v578_v20, %v1336_v37 }
 0xdd4   : > { %v585_v22 = vadd.f32 %v583_v21, %v1320_v52 }
 0xdd6   : > { %v586_v23 = vsel %vm255_vm3, %v585_v22, -inf }
 0xdd7   : > { %587 = vmax.xlane.f32.xlu1 %v586_v23 }
 0xe64   : > { %v588_v24 = vpop.xlane.xlu1 %587 }
 0xe65   : > { %v589_v25 = vsub.f32 %v585_v22, %v588_v24 }
 0xe67   : > { %v590_v27 = vmul.f32 1.442695, %v589_v25 }
 0xe69   : > { %1120 = vpow2.f32 %v590_v27 }
 0xe73   : > { %v1121_v28 = vpop.eup %1120 }
 0xe74   : > { %v592_v29 = vsel %vm255_vm3, %v1121_v28, 0.0 }
 0xe75   : > { %593 = vadd.xlane.f32.xlu0 %v592_v29 }
 0xf02   : > { %v594_v30 = vpop.xlane.xlu0 %593 }
 0xf03   : > { %1122 = vlog2.f32 %v594_v30 }
 0xf0d   : > { %v1123_v31 = vpop.eup %1122 }
 0xf0e   : > { %v596_v32 = vmul.f32 0.6931472, %v1123_v31 }
 0xf10   : > { %v597_v33 = vadd.f32 %v596_v32, %v588_v24 }
 0xf12   : > { %v598_v34 = vsub.f32 %v1316_v40, %v597_v33 }
 0xf14   : > { %601 = vperm.xlu0 %1071, %v598_v34  }
 0xf93   : > { %v602_v35 = vpop.permute.xlu0 %601 }
 0xf94   : > { %v604_v36 = vadd.f32 %v602_v35, %v1320_v52 }
 0xf96   : > { %v605_v38 = vsel %vm255_vm3, %v604_v36, -inf }
 0xf97   : > { %v606_v39 = vrot.slane %v605_v38, 4 }
 0xf99   : > { %v607_v42 = vmax.f32 %v605_v38, %v606_v39 }
 0xf9b   : > { %v608_v43 = vrot.slane %v607_v42, 2 }
 0xf9d   : > { %v609_v44 = vmax.f32 %v607_v42, %v608_v43 }
 0xf9f   : > { %v610_v45 = vrot.slane %v609_v44, 1 }
 0xfa1   : > { %v611_v46 = vmax.f32 %v609_v44, %v610_v45 }
 0xfa3   : > { %v612_v47 = vsub.f32 %v604_v36, %v611_v46 }
 0xfa5   : > { %v613_v48 = vmul.f32 1.442695, %v612_v47 }
 0xfa7   : > { %1124 = vpow2.f32 %v613_v48 }
 0xfb1   : > { %v1125_v49 = vpop.eup %1124 }
 0xfb2   : > { %v615_v50 = vsel %vm255_vm3, %v1125_v49, 0.0 }
 0xfb3   : > { %v616_v51 = vrot.slane %v615_v50, 4 }
 0xfb5   : > { %v617_v53 = vadd.f32 %v616_v51, %v615_v50 }
 0xfb7   : > { %v618_v54 = vrot.slane %v617_v53, 2 }
 0xfb9   : > { %v619_v55 = vadd.f32 %v618_v54, %v617_v53 }
 0xfbb   : > { %v620_v56 = vrot.slane %v619_v55, 1 }
 0xfbd   : > { %v621_v57 = vadd.f32 %v620_v56, %v619_v55 }
 0xfbf   : > { %1126 = vlog2.f32 %v621_v57 }
 0xfc9   : > { %v1127_v58 = vpop.eup %1126 }
 0xfca   : > { %v623_v59 = vmul.f32 0.6931472, %v1127_v58 }
 0xfcc   : > { %v624_v60 = vadd.f32 %v623_v59, %v611_v46 }
 0xfce   : > { %v625_v62 = vsub.f32 %v1318_v41, %v624_v60 }
 0xfd0   : > { %v630_v63 = vrot.slane %v625_v62, %v1336_v37 }
 0xfd2   : > { %v632_v2 = vadd.f32 %v630_v63, %v1320_v52 }
 0xfd4   : > { %v633_v3 = vsel %vm255_vm3, %v632_v2, -inf }
 0xfd5   : > { %634 = vmax.xlane.f32.xlu1 %v633_v3 }
0x1062   : > { %v635_v4 = vpop.xlane.xlu1 %634 }
0x1063   : > { %v636_v5 = vsub.f32 %v632_v2, %v635_v4 }
0x1065   : > { %v637_v6 = vmul.f32 1.442695, %v636_v5 }
0x1067   : > { %1128 = vpow2.f32 %v637_v6 }
0x1071   : > { %v1129_v12 = vpop.eup %1128 }
0x1072   : > { %v639_v13 = vsel %vm255_vm3, %v1129_v12, 0.0 }
0x1073   : > { %640 = vadd.xlane.f32.xlu0 %v639_v13 }
0x1100   : > { %v641_v14 = vpop.xlane.xlu0 %640 }
0x1101   : > { %1130 = vlog2.f32 %v641_v14 }
0x110b   : > { %v1131_v16 = vpop.eup %1130 }
0x110c   : > { %v643_v17 = vmul.f32 0.6931472, %v1131_v16 }
0x110e   : > { %v644_v19 = vadd.f32 %v643_v17, %v635_v4 }
0x1110   : > { %v645_v20 = vsub.f32 %v1316_v40, %v644_v19 }
0x1112   : > { %648 = vperm.xlu1 %1070, %v645_v20  }
0x1191   : > { %v649_v21 = vpop.permute.xlu1 %648 }
0x1192   : > { %v651_v22 = vadd.f32 %v649_v21, %v1320_v52 }
0x1194   : > { %v652_v23 = vsel %vm255_vm3, %v651_v22, -inf }
0x1195   : > { %v653_v24 = vrot.slane %v652_v23, 4 }
0x1197   : > { %v654_v25 = vmax.f32 %v652_v23, %v653_v24 }
0x1199   : > { %v655_v27 = vrot.slane %v654_v25, 2 }
0x119b   : > { %v656_v28 = vmax.f32 %v654_v25, %v655_v27 }
0x119d   : > { %v657_v29 = vrot.slane %v656_v28, 1 }
0x119f   : > { %v658_v30 = vmax.f32 %v656_v28, %v657_v29 }
0x11a1   : > { %v659_v31 = vsub.f32 %v651_v22, %v658_v30 }
0x11a3   : > { %v660_v32 = vmul.f32 1.442695, %v659_v31 }
0x11a5   : > { %1132 = vpow2.f32 %v660_v32 }
0x11af   : > { %v1133_v33 = vpop.eup %1132 }
0x11b0   : > { %v662_v34 = vsel %vm255_vm3, %v1133_v33, 0.0 }
0x11b1   : > { %v663_v35 = vrot.slane %v662_v34, 4 }
0x11b3   : > { %v664_v36 = vadd.f32 %v663_v35, %v662_v34 }
0x11b5   : > { %v665_v38 = vrot.slane %v664_v36, 2 }
0x11b7   : > { %v666_v39 = vadd.f32 %v665_v38, %v664_v36 }
0x11b9   : > { %v667_v42 = vrot.slane %v666_v39, 1 }
0x11bb   : > { %v668_v43 = vadd.f32 %v667_v42, %v666_v39 }
0x11bd   : > { %1134 = vlog2.f32 %v668_v43 }
0x11c7   : > { %v1135_v44 = vpop.eup %1134 }
0x11c8   : > { %v670_v45 = vmul.f32 0.6931472, %v1135_v44 }
0x11ca   : > { %v671_v46 = vadd.f32 %v670_v45, %v658_v30 }
0x11cc   : > { %v672_v47 = vsub.f32 %v1318_v41, %v671_v46 }
0x11ce   : > { %v677_v48 = vrot.slane %v672_v47, %v1336_v37 }
0x11d0   : > { %v679_v49 = vadd.f32 %v677_v48, %v1320_v52 }
0x11d2   : > { %v680_v50 = vsel %vm255_vm3, %v679_v49, -inf }
0x11d3   : > { %681 = vmax.xlane.f32.xlu1 %v680_v50 }
0x1260   : > { %v682_v51 = vpop.xlane.xlu1 %681 }
0x1261   : > { %v683_v53 = vsub.f32 %v679_v49, %v682_v51 }
0x1263   : > { %v684_v54 = vmul.f32 1.442695, %v683_v53 }
0x1265   : > { %1136 = vpow2.f32 %v684_v54 }
0x126f   : > { %v1137_v55 = vpop.eup %1136 }
0x1270   : > { %v686_v56 = vsel %vm255_vm3, %v1137_v55, 0.0 }
0x1271   : > { %687 = vadd.xlane.f32.xlu0 %v686_v56 }
0x12fe   : > { %v688_v57 = vpop.xlane.xlu0 %687 }
0x12ff   : > { %1138 = vlog2.f32 %v688_v57 }
0x1309   : > { %v1139_v58 = vpop.eup %1138 }
0x130a   : > { %v690_v59 = vmul.f32 0.6931472, %v1139_v58 }
0x130c   : > { %v691_v60 = vadd.f32 %v690_v59, %v682_v51 }
0x130e   : > { %v692_v62 = vsub.f32 %v1316_v40, %v691_v60 }
0x1310   : > { %695 = vperm.xlu0 %1071, %v692_v62  }
0x138f   : > { %v696_v63 = vpop.permute.xlu0 %695 }
0x1390   : > { %v698_v2 = vadd.f32 %v696_v63, %v1320_v52 }
0x1392   : > { %v699_v3 = vsel %vm255_vm3, %v698_v2, -inf }
0x1393   : > { %v700_v4 = vrot.slane %v699_v3, 4 }
0x1395   : > { %v701_v5 = vmax.f32 %v699_v3, %v700_v4 }
0x1397   : > { %v702_v6 = vrot.slane %v701_v5, 2 }
0x1399   : > { %v703_v12 = vmax.f32 %v701_v5, %v702_v6 }
0x139b   : > { %v704_v13 = vrot.slane %v703_v12, 1 }
0x139d   : > { %v705_v14 = vmax.f32 %v703_v12, %v704_v13 }
0x139f   : > { %v706_v16 = vsub.f32 %v698_v2, %v705_v14 }
0x13a1   : > { %v707_v17 = vmul.f32 1.442695, %v706_v16 }
0x13a3   : > { %1140 = vpow2.f32 %v707_v17 }
0x13ad   : > { %v1141_v19 = vpop.eup %1140 }
0x13ae   : > { %v709_v20 = vsel %vm255_vm3, %v1141_v19, 0.0 }
0x13af   : > { %v710_v21 = vrot.slane %v709_v20, 4 }
0x13b1   : > { %v711_v22 = vadd.f32 %v710_v21, %v709_v20 }
0x13b3   : > { %v712_v23 = vrot.slane %v711_v22, 2 }
0x13b5   : > { %v713_v24 = vadd.f32 %v712_v23, %v711_v22 }
0x13b7   : > { %v714_v25 = vrot.slane %v713_v24, 1 }
0x13b9   : > { %v715_v27 = vadd.f32 %v714_v25, %v713_v24 }
0x13bb   : > { %1142 = vlog2.f32 %v715_v27 }
0x13c5   : > { %v1143_v28 = vpop.eup %1142 }
0x13c6   : > { %v717_v29 = vmul.f32 0.6931472, %v1143_v28 }
0x13c8   : > { %v718_v30 = vadd.f32 %v717_v29, %v705_v14 }
0x13ca   : > { %v719_v31 = vsub.f32 %v1318_v41, %v718_v30 }
0x13cc   : > { %v724_v32 = vrot.slane %v719_v31, %v1336_v37  ;;  %v295_v37 = vld [vmem:[#allocation2] sm:$0xff] }
0x13ce   : > { %v726_v33 = vadd.f32 %v724_v32, %v1320_v52 }
0x13d0   : > { %v727_v34 = vsel %vm255_vm3, %v726_v33, -inf }
0x13d1   : > { %728 = vmax.xlane.f32.xlu1 %v727_v34 }
0x145e   : > { %v729_v35 = vpop.xlane.xlu1 %728 }
0x145f   : > { %v730_v36 = vsub.f32 %v726_v33, %v729_v35 }
0x1461   : > { %v731_v38 = vmul.f32 1.442695, %v730_v36 }
0x1463   : > { %1144 = vpow2.f32 %v731_v38 }
0x146d   : > { %v1145_v39 = vpop.eup %1144 }
0x146e   : > { %v733_v42 = vsel %vm255_vm3, %v1145_v39, 0.0 }
0x146f   : > { %734 = vadd.xlane.f32.xlu0 %v733_v42 }
0x14fc   : > { %v735_v43 = vpop.xlane.xlu0 %734 }
0x14fd   : > { %1146 = vlog2.f32 %v735_v43 }
0x1507   : > { %v1147_v44 = vpop.eup %1146 }
0x1508   : > { %v737_v45 = vmul.f32 0.6931472, %v1147_v44 }
0x150a   : > { %v738_v46 = vadd.f32 %v737_v45, %v729_v35 }
0x150c   : > { %v739_v47 = vsub.f32 %v1316_v40, %v738_v46 }
0x150e   : > { %742 = vperm.xlu1 %1070, %v739_v47   ;;  %767 = vst.msk [vmem:[#allocation2] sm:$0xff] %vm282_vm0, %v739_v47  ;;  %v769_v48 = vsub.f32 %v739_v47, %v295_v37 }
0x1510   : > { %v770_v49 = vand.u32 2147483647, %v769_v48 }
0x1512   : > { %v771_v50 = vsel %vm282_vm0, %v770_v49, -inf }
0x1513   : > { %v772_v51 = vrot.slane %v771_v50, 4 }
0x1515   : > { %v773_v53 = vmax.f32 %v771_v50, %v772_v51 }
0x1517   : > { %v774_v54 = vrot.slane %v773_v53, 2 }
0x1519   : > { %v775_v55 = vmax.f32 %v773_v53, %v774_v54 }
0x151b   : > { %v776_v56 = vrot.slane %v775_v55, 1 }
0x151d   : > { %v777_v57 = vmax.f32 %v775_v55, %v776_v56 }
0x151f   : > { %vm778_vm6 = vcmp.gt.f32.partialorder %v777_v57, 1e-06 }
0x1520   : > { %v779_v58 = vsel %vm778_vm6, 1, %v1194_v61 }
0x1521   : > { %781 = vst.msk [vmem:[#allocation4] sm:$0x1] %vm780_vm5, %v779_v58 }
0x1528   : > { %v783_v59 = vld [vmem:[#allocation4] sm:$0x1] }
0x1529   : > { %1048 = vpush %v783_v59 }
0x155a   : > { %s1049_s17 = spop %1048 }
0x155b   : > { %p290_p1 = scmp.gt.s32.totalorder %s1049_s17, 0 }
0x155d   : > { %p291_p2 = pnand %p290_p1, %p289_p0 }
0x155e   :  { %1152 = vset.pattern.permute.xlu0 (%p291_p2), %v1193_v26  ;;  %v785_v29 = vld [vmem:[#allocation2] sm:$0xff] (%p291_p2)  ;;  %1030 = vmatprep.mubr.msk.f32.mxu0 (%p291_p2), %vm255_vm3, %v1265_v9  ;;  %v909_v9 = vmul.f32 (%p291_p2), %v1259_v8, %v1242_v1  ;;  %v911_v26 = vmul.f32 (%p291_p2), %v1259_v8, %v1295_v18  ;;  %v910_v40 = vmul.f32 (%p291_p2), %v1259_v8, %v1254_v7  ;;  %vm920_vm7 = vcmask (%p291_p2), 64512   ;;  %s944_s18 = sld [smem:[#allocation5]] (%p291_p2)  ;;  %s1195_s22 = smov (%p291_p2), [#allocation6]  }
0x155f   :  { %789 = vperm.xlu0 (%p291_p2), %1152, %v785_v29   ;;  %1033 = vmatprep.mubr.msk.f32.mxu1 (%p291_p2), %vm255_vm3, %v1275_v11  ;;  %v908_v11 = vmul.f32 (%p291_p2), %v1259_v8, %v1237_v0  ;;  %s965_s23 = sshll.u32 (%p291_p2), %s1195_s22, 4  ;;  %s966_s23 = int_to_ptr.vmem [resolvable:$true] %s965_s23 }
0x1560   :  { %s1157_s24 = scalar_lea.vmem (%p291_p2), %s966_s23, 16  ;;  %s1161_s25 = scalar_lea.vmem (%p291_p2), %s966_s23, 32 }
0x1561   :  { %p1158_p3 = scmp.ne.s32.totalorder (%p291_p2), %s966_s23, %s1157_s24  ;;  %p1162_p4 = scmp.lt.s32.totalorder (%p291_p2), %s966_s23, %s966_s23 }
0x1562   :  { %p1163_p5 = scmp.lt.s32.totalorder (%p291_p2), %s1161_s25, %s1157_s24 }
0x1564   :  { %s945_s19 = smul.f32 (%p291_p2), 0.5, %s944_s18  ;;  %s949_s20 = ssub.f32 (%p291_p2), 1.0, %s944_s18 }
0x1565   :  { %p1164_p6 = por (%p291_p2), %p1163_p5, %p1162_p4 }
0x1566   :  { %s950_s21 = smul.f32 (%p291_p2), 0.5, %s949_s20 }
0x1567   :  { %p1165_p7 = pnand (%p291_p2), %p1164_p6, %p1158_p3 }
0x158d   : > { %v743_v60 = vpop.permute.xlu1 %742 }
0x158e   : > { %v745_v62 = vadd.f32 %v743_v60, %v1320_v52 }
0x1590   : > { %v746_v63 = vsel %vm255_vm3, %v745_v62, -inf }
0x1591   : > { %v747_v2 = vrot.slane %v746_v63, 4 }
0x1593   : > { %v748_v3 = vmax.f32 %v746_v63, %v747_v2 }
0x1595   : > { %v749_v4 = vrot.slane %v748_v3, 2 }
0x1597   : > { %v750_v5 = vmax.f32 %v748_v3, %v749_v4 }
0x1599   : > { %v751_v6 = vrot.slane %v750_v5, 1 }
0x159b   : > { %v752_v12 = vmax.f32 %v750_v5, %v751_v6  ;;  %v954_v5 = vstv (%p291_p2), %s950_s21 }
0x159d   : > { %v753_v13 = vsub.f32 %v745_v62, %v752_v12  ;;  %v946_v62 = vstv (%p291_p2), %s945_s19 }
0x159f   : > { %v754_v14 = vmul.f32 1.442695, %v753_v13 }
0x15a1   : > { %1148 = vpow2.f32 %v754_v14 }
0x15ab   : > { %v1149_v61 = vpop.eup %1148 }
0x15ac   : > { %v756_v16 = vsel %vm255_vm3, %v1149_v61, 0.0 }
0x15ad   : > { %v757_v17 = vrot.slane %v756_v16, 4 }
0x15af   : > { %v758_v19 = vadd.f32 %v757_v17, %v756_v16 }
0x15b1   : > { %v759_v20 = vrot.slane %v758_v19, 2 }
0x15b3   : > { %v760_v21 = vadd.f32 %v759_v20, %v758_v19 }
0x15b5   : > { %v761_v22 = vrot.slane %v760_v21, 1 }
0x15b7   : > { %v762_v23 = vadd.f32 %v761_v22, %v760_v21 }
0x15b9   : > { %1150 = vlog2.f32 %v762_v23 }
0x15c3   : > { %v1151_v24 = vpop.eup %1150 }
0x15c4   : > { %v764_v25 = vmul.f32 0.6931472, %v1151_v24  ;;  %294 = sbr.rel (!%p291_p2) target bundleno = 479 (0x1df), region = 51 }
0x15c6   : > { %v765_v27 = vadd.f32 %v764_v25, %v752_v12 }
0x15c8   : > { %v766_v28 = vsub.f32 %v1318_v41, %v765_v27 }
0x15ca   : > { %768 = vst.msk [vmem:[#allocation3] sm:$0x1] %vm284_vm1, %v766_v28 }
0x15d1   :  { %v984_v30 = vld [vmem:[#allocation3] ss:$0 sm:$0xff] }
0x15de   :  { %v790_v31 = vpop.permute.xlu0 %789 }
0x15df   :  { %v792_v32 = vadd.f32 %v790_v31, %v1320_v52 }
0x15e1   :  { %v799_v33 = vadd.f32 %v984_v30, %v792_v32 }
0x15e3   :  { %v800_v34 = vmul.f32 1.442695, %v799_v33 }
0x15e5   :  { %1153 = vpow2.f32 %v800_v34 }
0x15ef   :  { %v1154_v35 = vpop.eup %1153 }
0x15f0   :  { %1028 = vmatprep.subr.msk.mxu0 %vm255_vm3, %v1154_v35  ;;  %1046 = vmatprep.subr.msk.mxu1 %vm255_vm3, %v1154_v35 }
0x15f1   :  { %1029 = vmatpush3.xpose.msk.msra.mxu0 %vm255_vm3, %v1154_v35  ;;  %1047 = vmatpush3.xpose.msk.msra.mxu1 %vm255_vm3, %v1154_v35 }
0x15f4   :  { %1031 = vmatmul.mubr.msk.f32.vlgmr.msra.gmra.mrb[2].mxu0 %vm255_vm3, %v1270_v10  ;;  %1034 = vmatmul.mubr.msk.f32.vlgmr.msra.gmra.mrb[2].mxu1 %vm255_vm3, %v1286_v15 }
0x16c7   :  { %v1032_v41 = vpop.f32.mrb[2].mxu0  ;;  %v1035_v52 = vpop.f32.mrb[2].mxu1 }
0x16c8   :  { %v913_v36 = vsub.f32 %v909_v9, %v1032_v41  ;;  %v883_v38 = vpop.f32.mrb[3].mxu0  ;;  %v893_v10 = vpop.f32.mrb[3].mxu1  ;;  %v915_v15 = vsub.f32 %v911_v26, %v1035_v52 }
0x16c9   :  { %v912_v39 = vsub.f32 %v908_v11, %v883_v38  ;;  %v914_v42 = vsub.f32 %v910_v40, %v893_v10 }
0x16ca   :  { %v917_v43 = vmul.f32 %v913_v36, %v913_v36  ;;  %v919_v18 = vmul.f32 %v915_v15, %v915_v15 }
0x16cb   :  { %v916_v1 = vmul.f32 %v912_v39, %v912_v39  ;;  %v918_v44 = vmul.f32 %v914_v42, %v914_v42 }
0x16cc   :  { %v922_v0 = vsel %vm920_vm7, %v917_v43, 0.0  ;;  %v926_v37 = vsel %vm920_vm7, %v919_v18, 0.0 }
0x16cd   :  { %v921_v45 = vsel %vm920_vm7, %v916_v1, 0.0  ;;  %v924_v46 = vsel %vm920_vm7, %v918_v44, 0.0 }
0x16ce   :  { %v923_v7 = vadd.f32 %v922_v0, %v921_v45 }
0x16d0   :  { %v925_v8 = vadd.f32 %v924_v46, %v923_v7 }
0x16d2   :  { %v927_v47 = vadd.f32 %v926_v37, %v925_v8 }
0x16d4   :  { %v928_v48 = vrot.slane %v927_v47, 4 }
0x16d6   :  { %v929_v49 = vadd.f32 %v928_v48, %v927_v47 }
0x16d8   :  { %v930_v50 = vrot.slane %v929_v49, 2 }
0x16da   :  { %v931_v51 = vadd.f32 %v930_v50, %v929_v49 }
0x16dc   :  { %v932_v53 = vrot.slane %v931_v51, 1 }
0x16de   :  { %v933_v54 = vadd.f32 %v932_v53, %v931_v51 }
0x16e0   :  { %1155 = vrsqrt.f32 %v933_v54  ;;  %vm936_vm8 = vcmp.eq.f32.partialorder %v933_v54, inf  ;;  %v939_v57 = vand.u32 2147483648, %v933_v54  ;;  %vm938_vm9 = vcmp.eq.f32.partialorder %v933_v54, 0.0 }
0x16ea   :  { %v1156_v55 = vpop.eup %1155 }
0x16eb   :  { %v935_v56 = vmul.f32 %v1156_v55, %v933_v54 }
0x16ed   :  { %v937_v58 = vsel %vm936_vm8, %v933_v54, %v935_v56 }
0x16ee   :  { %v940_v59 = vsel %vm938_vm9, %v939_v57, %v937_v58 }
0x16ef   :  { %v941_v60 = vsel %vm920_vm7, %v940_v59, 0.0 }
0x16f0   :  { %942 = vadd.xlane.f32.xlu0 %v941_v60 }
0x177d   :  { %v943_v63 = vpop.xlane.xlu0 %942 }
0x177e   :  { %v951_v2 = vsub.f32 0.7, %v943_v63  ;;  %v947_v3 = vmul.f32 %v946_v62, %v943_v63 }
0x1780   :  { %v952_v4 = vmax.f32 %v951_v2, 0.0  ;;  %v948_v12 = vmul.f32 %v947_v3, %v943_v63 }
0x1782   :  { %v953_v6 = vmul.f32 %v952_v4, %v952_v4 }
0x1784   :  { %v955_v13 = vmul.f32 %v954_v5, %v953_v6 }
0x1786   :  { %v956_v14 = vadd.f32 %v955_v13, %v948_v12 }
0x1788   :  { %958 = vst.msk [vmem:[#allocation6] sm:$0x1] %vm780_vm5, %v956_v14 }
0x1789   :  { %1168 = shalt.err (!%p1165_p7)
}
0x178a   :  { %s1169_s27 = scalar_lea.hbm %s1478_s6, 16 }
0x178b   :  { %p1170_p8 = scmp.ne.s32.totalorder %s1478_s6, %s1169_s27  ;;  %p1173_p9 = scmp.lt.u32.totalorder %s1169_s27, %s1478_s6 }
0x178d   :  { %p1175_p10 = pnand %p1173_p9, %p1170_p8 }
0x178f   :  { %1178 = shalt.err (!%p1175_p10)
}
0x1790   :  { %968 = dma.vmem_to_hbm [thread:$0]  %s966_s23, 16, %s1478_s6, [#allocation7]  }
0x1791   :  { %1183 = dma.done.wait [#allocation7], 16  }
0x1792   :  { %1184 = vsyncadd [#allocation7], 4294967280 }
0x1793   :  { %972 = vsyncpa [#allocation7], 1 }

</bundles_post_ra>
